<compile_context>
chip_gen: v5e
topology: v5e:2x2
jax: 0.10.0
libtpu: 0.0.40
codegen_flags: <defaults>
</compile_context>

<pallas_src>
import math
import numpy as np

import jax
import jax.numpy as jnp
from jax.experimental import pallas as pl
from jax.experimental.pallas import tpu as pltpu  # noqa: F401  (kept for TPU-specific params if scaled up)

# ----------------------------- config (small, deterministic) -----------------------------
NTOKENS = 50
NTOKENS_PAD = 64          # decoder N padded to a lane-friendly width; padded cols masked via bias
EMSIZE = 32
NHEADS = 2
HEAD_DIM = EMSIZE // NHEADS
NHID = 64
SEQLEN = 8
BATCH = 2
NEXPERT = 4
NLAYERS = 2               # layer 0: standard TransformerEncoderLayer, layer 1: Top2 MoE layer
EPS_LN = 1e-5
NEG = -1e30               # "minus infinity" that stays finite under arithmetic


# ----------------------------- in-kernel helpers (pure jnp on VMEM values) -----------------------------
def _layer_norm(z, g, b):
    mu = jnp.mean(z, axis=-1, keepdims=True)
    d = z - mu
    var = jnp.mean(d * d, axis=-1, keepdims=True)
    return d * jax.lax.rsqrt(var + EPS_LN) * g + b


def _self_attention(x, w_in, b_in, w_out, b_out):
    # x: (B*S, E).  QKV projection + per-(batch, head) causal softmax attention, fully in-VMEM.
    qkv = jnp.dot(x, w_in, preferred_element_type=jnp.float32) + b_in      # (M, 3E)
    q = qkv[:, :EMSIZE]
    k = qkv[:, EMSIZE:2 * EMSIZE]
    v = qkv[:, 2 * EMSIZE:]
    scale = 1.0 / math.sqrt(HEAD_DIM)
    row_i = jax.lax.broadcasted_iota(jnp.int32, (SEQLEN, SEQLEN), 0)
    col_j = jax.lax.broadcasted_iota(jnp.int32, (SEQLEN, SEQLEN), 1)
    batch_outs = []
    for b in range(BATCH):                      # static unroll (B=2)
        r0 = b * SEQLEN
        head_outs = []
        for h in range(NHEADS):                 # static unroll (H=2)
            c0 = h * HEAD_DIM
            qb = q[r0:r0 + SEQLEN, c0:c0 + HEAD_DIM]
            kb = k[r0:r0 + SEQLEN, c0:c0 + HEAD_DIM]
            vb = v[r0:r0 + SEQLEN, c0:c0 + HEAD_DIM]
            s = jax.lax.dot_general(qb, kb, (((1,), (1,)), ((), ())),
                                    preferred_element_type=jnp.float32) * scale
            s = jnp.where(col_j <= row_i, s, NEG)            # causal mask built in-kernel
            s = s - jnp.max(s, axis=-1, keepdims=True)
            p = jnp.exp(s)
            p = p / jnp.sum(p, axis=-1, keepdims=True)
            head_outs.append(jnp.dot(p, vb, preferred_element_type=jnp.float32))
        batch_outs.append(jnp.concatenate(head_outs, axis=-1))
    o = jnp.concatenate(batch_outs, axis=0)                  # (M, E)
    return jnp.dot(o, w_out, preferred_element_type=jnp.float32) + b_out


def _top2_combine_weights(gate_logits):
    # DeepSpeed top2gating (no noise / no capacity dropping); argmax tie-break = lowest index.
    m = jnp.max(gate_logits, axis=-1, keepdims=True)
    e = jnp.exp(gate_logits - m)
    gates = e / jnp.sum(e, axis=-1, keepdims=True)           # (M, NEXPERT)
    ids = jax.lax.broadcasted_iota(jnp.int32, gates.shape, 1).astype(jnp.float32)
    gmax1 = jnp.max(gates, axis=-1, keepdims=True)
    idx1 = jnp.min(jnp.where(gates >= gmax1, ids, float(NEXPERT)), axis=-1, keepdims=True)
    m1 = (ids == idx1).astype(jnp.float32)
    masked = jnp.where(m1 > 0, NEG, gates)
    gmax2 = jnp.max(masked, axis=-1, keepdims=True)
    idx2 = jnp.min(jnp.where(masked >= gmax2, ids, float(NEXPERT)), axis=-1, keepdims=True)
    m2 = (ids == idx2).astype(jnp.float32)
    g1 = jnp.sum(gates * m1, axis=-1, keepdims=True)
    g2 = jnp.sum(gates * m2, axis=-1, keepdims=True)
    denom = jnp.maximum(g1 + g2, jnp.float32(np.finfo(np.float32).eps))
    return (gates * m1 + gates * m2) / denom                  # (M, NEXPERT)


# ----------------------------- the fused Pallas kernel -----------------------------
def fused_forward_kernel(
    h_ref, y_ref,
    # layer 0 (standard)
    a0_win, a0_bin, a0_wout, a0_bout, l0_ln1g, l0_ln1b, l0_ln2g, l0_ln2b,
    l0_w1, l0_b1, l0_w2, l0_b2,
    # layer 1 (top-2 MoE)
    a1_win, a1_bin, a1_wout, a1_bout, l1_ln1g, l1_ln1b, l1_ln2g, l1_ln2b,
    l1_wg, l1_ew1, l1_eb1, l1_ew2, l1_eb2,
    # decoder (padded to NTOKENS_PAD lanes)
    wdec, bdec,
    # output
    loss_ref,
):
    x = h_ref[...]                                            # (M, E) stays in VMEM throughout

    # ---- layer 0: standard transformer encoder layer ----
    a = _self_attention(x, a0_win[...], a0_bin[...], a0_wout[...], a0_bout[...])
    x = _layer_norm(x + a, l0_ln1g[...], l0_ln1b[...])
    hmid = jnp.maximum(
        jnp.dot(x, l0_w1[...], preferred_element_type=jnp.float32) + l0_b1[...], 0.0)
    f = jnp.dot(hmid, l0_w2[...], preferred_element_type=jnp.float32) + l0_b2[...]
    x = _layer_norm(x + f, l0_ln2g[...], l0_ln2b[...])

    # ---- layer 1: top-2 MoE encoder layer ----
    a = _self_attention(x, a1_win[...], a1_bin[...], a1_wout[...], a1_bout[...])
    x = _layer_norm(x + a, l1_ln1g[...], l1_ln1b[...])
    gate_logits = jnp.dot(x, l1_wg[...], preferred_element_type=jnp.float32)   # gate has no bias
    cw = _top2_combine_weights(gate_logits)                                    # (M, NEXPERT)
    # fused experts: relu(x @ W1_cat + b1_cat); scale each expert's 64-lane chunk by its combine
    # weight; one matmul against W2 stacked along K; bias term via cw @ stacked-b2.
    hcat = jnp.maximum(
        jnp.dot(x, l1_ew1[...], preferred_element_type=jnp.float32) + l1_eb1[...], 0.0)   # (M, 256)
    hs = jnp.concatenate(
        [cw[:, e:e + 1] * hcat[:, e * NHID:(e + 1) * NHID] for e in range(NEXPERT)], axis=-1)
    moe = (jnp.dot(hs, l1_ew2[...], preferred_element_type=jnp.float32)
           + jnp.dot(cw, l1_eb2[...], preferred_element_type=jnp.float32))
    x = _layer_norm(x + moe, l1_ln2g[...], l1_ln2b[...])

    # ---- decoder + log_softmax + NLLLoss(reduction='sum') ----
    logits = jnp.dot(x, wdec[...], preferred_element_type=jnp.float32) + bdec[...]   # (M, NTOKENS_PAD)
    m = jnp.max(logits, axis=-1, keepdims=True)
    lse = jnp.log(jnp.sum(jnp.exp(logits - m), axis=-1, keepdims=True)) + m           # (M, 1)
    cids = jax.lax.broadcasted_iota(jnp.int32, logits.shape, 1)
    tgt = jnp.sum(jnp.where(cids == y_ref[...], logits, 0.0), axis=-1, keepdims=True)  # (M, 1)
    loss_ref[...] = jnp.sum(lse - tgt, axis=0, keepdims=True)                          # (1, 1)


# ----------------------------- wrapper -----------------------------
def rmoe_forward(params, x_tokens, y_tokens):
    B, S = x_tokens.shape
    # embedding gather + positional encoding (plain-JAX glue; single gather op)
    h = jnp.take(params["emb"], x_tokens, axis=0) * math.sqrt(EMSIZE) + params["pe"]   # (B,S,E)
    h2d = h.reshape(B * S, EMSIZE).astype(jnp.float32)
    y2d = y_tokens.reshape(B * S, 1).astype(jnp.int32)
    l0, l1 = params["layers"]
    args = (
        h2d, y2d,
        l0["attn"]["w_in"], l0["attn"]["b_in"], l0["attn"]["w_out"], l0["attn"]["b_out"],
        l0["ln1_g"], l0["ln1_b"], l0["ln2_g"], l0["ln2_b"],
        l0["w1"], l0["b1"], l0["w2"], l0["b2"],
        l1["attn"]["w_in"], l1["attn"]["b_in"], l1["attn"]["w_out"], l1["attn"]["b_out"],
        l1["ln1_g"], l1["ln1_b"], l1["ln2_g"], l1["ln2_b"],
        l1["wg"], l1["ew1_cat"], l1["eb1_cat"], l1["ew2_cat"], l1["eb2_stack"],
        params["wdec_pad"], params["bdec_pad"],
    )
    # Single pallas_call: whole forward, everything resident in VMEM, no grid.
    loss = pl.pallas_call(
        fused_forward_kernel,
        out_shape=jax.ShapeDtypeStruct((1, 1), jnp.float32),
    )(*args)
    return loss[0, 0]


# ----------------------------- deterministic parameter init -----------------------------
def positional_encoding(seqlen, emsize):
    pe = np.zeros((seqlen, emsize), dtype=np.float32)
    pos = np.arange(seqlen, dtype=np.float32)[:, None]
    div = np.exp(np.arange(0, emsize, 2, dtype=np.float32) * (-math.log(10000.0) / emsize))
    pe[:, 0::2] = np.sin(pos * div)
    pe[:, 1::2] = np.cos(pos * div)
    return pe[None]  # (1, S, E)


def init_params(key):
    def nrm(k, shape, scale=0.02):
        return scale * jax.random.normal(k, shape, dtype=jnp.float32)

    keys = iter(jax.random.split(key, 64))
    emb = nrm(next(keys), (NTOKENS, EMSIZE), 1.0)
    wdec = nrm(next(keys), (EMSIZE, NTOKENS))
    bdec = jnp.zeros((1, NTOKENS), jnp.float32)
    params = {
        "emb": emb,
        "pe": jnp.asarray(positional_encoding(SEQLEN, EMSIZE)),
        # decoder padded to NTOKENS_PAD lanes; padded columns get a -1e30 bias so they never
        # affect max / logsumexp and never match a target id.
        "wdec_pad": jnp.zeros((EMSIZE, NTOKENS_PAD), jnp.float32).at[:, :NTOKENS].set(wdec),
        "bdec_pad": jnp.full((1, NTOKENS_PAD), NEG, jnp.float32).at[:, :NTOKENS].set(bdec),
        "layers": [],
    }
    for i in range(NLAYERS):
        attn = {
            "w_in": nrm(next(keys), (EMSIZE, 3 * EMSIZE)),
            "b_in": jnp.zeros((1, 3 * EMSIZE), jnp.float32),
            "w_out": nrm(next(keys), (EMSIZE, EMSIZE)),
            "b_out": jnp.zeros((1, EMSIZE), jnp.float32),
        }
        common = {
            "attn": attn,
            "ln1_g": jnp.ones((1, EMSIZE), jnp.float32),
            "ln1_b": jnp.zeros((1, EMSIZE), jnp.float32),
            "ln2_g": jnp.ones((1, EMSIZE), jnp.float32),
            "ln2_b": jnp.zeros((1, EMSIZE), jnp.float32),
        }
        if i % 2 == 0:
            common.update(
                w1=nrm(next(keys), (EMSIZE, NHID)),
                b1=jnp.zeros((1, NHID), jnp.float32),
                w2=nrm(next(keys), (NHID, EMSIZE)),
                b2=jnp.zeros((1, EMSIZE), jnp.float32),
            )
        else:
            ew1 = nrm(next(keys), (NEXPERT, EMSIZE, NHID))
            eb1 = jnp.zeros((NEXPERT, 1, NHID), jnp.float32)
            ew2 = nrm(next(keys), (NEXPERT, NHID, EMSIZE))
            eb2 = jnp.zeros((NEXPERT, 1, EMSIZE), jnp.float32)
            common.update(
                wg=nrm(next(keys), (EMSIZE, NEXPERT)),
                # pre-fused expert layouts (done once at init, not per call):
                ew1_cat=jnp.concatenate([ew1[e] for e in range(NEXPERT)], axis=1),    # (E, NE*NHID)
                eb1_cat=jnp.concatenate([eb1[e] for e in range(NEXPERT)], axis=1),    # (1, NE*NHID)
                ew2_cat=jnp.concatenate([ew2[e] for e in range(NEXPERT)], axis=0),    # (NE*NHID, E)
                eb2_stack=jnp.concatenate([eb2[e] for e in range(NEXPERT)], axis=0),  # (NE, E)
            )
        params["layers"].append(common)
    return params


# ----------------------------- main -----------------------------
if __name__ == "__main__":
    key = jax.random.PRNGKey(0)
    k_param, k_x, k_y = jax.random.split(key, 3)
    params = init_params(k_param)

    x_tokens = jax.random.randint(k_x, (BATCH, SEQLEN), 0, NTOKENS, dtype=jnp.int32)
    y_tokens = jax.random.randint(k_y, (BATCH, SEQLEN), 0, NTOKENS, dtype=jnp.int32)

    loss = jax.jit(rmoe_forward)(params, x_tokens, y_tokens)
    loss = jax.block_until_ready(loss)
    assert jnp.isfinite(loss), "loss is not finite"
    print("KERNEL_OK")
</pallas_src>

<mosaic_0001>
module attributes {stable_mosaic.version = 11 : i64} {
  func.func @fused_forward_kernel(%arg0: memref<16x32xf32, #tpu.memory_space<vmem>>, %arg1: memref<16x1xi32, #tpu.memory_space<vmem>>, %arg2: memref<32x96xf32, #tpu.memory_space<vmem>>, %arg3: memref<1x96xf32, #tpu.memory_space<vmem>>, %arg4: memref<32x32xf32, #tpu.memory_space<vmem>>, %arg5: memref<1x32xf32, #tpu.memory_space<vmem>>, %arg6: memref<1x32xf32, #tpu.memory_space<vmem>>, %arg7: memref<1x32xf32, #tpu.memory_space<vmem>>, %arg8: memref<1x32xf32, #tpu.memory_space<vmem>>, %arg9: memref<1x32xf32, #tpu.memory_space<vmem>>, %arg10: memref<32x64xf32, #tpu.memory_space<vmem>>, %arg11: memref<1x64xf32, #tpu.memory_space<vmem>>, %arg12: memref<64x32xf32, #tpu.memory_space<vmem>>, %arg13: memref<1x32xf32, #tpu.memory_space<vmem>>, %arg14: memref<32x96xf32, #tpu.memory_space<vmem>>, %arg15: memref<1x96xf32, #tpu.memory_space<vmem>>, %arg16: memref<32x32xf32, #tpu.memory_space<vmem>>, %arg17: memref<1x32xf32, #tpu.memory_space<vmem>>, %arg18: memref<1x32xf32, #tpu.memory_space<vmem>>, %arg19: memref<1x32xf32, #tpu.memory_space<vmem>>, %arg20: memref<1x32xf32, #tpu.memory_space<vmem>>, %arg21: memref<1x32xf32, #tpu.memory_space<vmem>>, %arg22: memref<32x4xf32, #tpu.memory_space<vmem>>, %arg23: memref<32x256xf32, #tpu.memory_space<vmem>>, %arg24: memref<1x256xf32, #tpu.memory_space<vmem>>, %arg25: memref<256x32xf32, #tpu.memory_space<vmem>>, %arg26: memref<4x32xf32, #tpu.memory_space<vmem>>, %arg27: memref<32x64xf32, #tpu.memory_space<vmem>>, %arg28: memref<1x64xf32, #tpu.memory_space<vmem>>, %arg29: memref<1x1xf32, #tpu.memory_space<vmem>>) attributes {dimension_semantics = [], scalar_prefetch = 0 : i64, scratch_operands = 0 : i64, tpu.core_type = #tpu.core_type<tc>} {
    %c0 = arith.constant 0 : index
    %c0_0 = arith.constant 0 : index
    %0 = vector.load %arg0[%c0, %c0_0] : memref<16x32xf32, #tpu.memory_space<vmem>>, vector<16x32xf32>
    %c0_1 = arith.constant 0 : index
    %c0_2 = arith.constant 0 : index
    %1 = vector.load %arg2[%c0_1, %c0_2] : memref<32x96xf32, #tpu.memory_space<vmem>>, vector<32x96xf32>
    %c0_3 = arith.constant 0 : index
    %c0_4 = arith.constant 0 : index
    %2 = vector.load %arg3[%c0_3, %c0_4] : memref<1x96xf32, #tpu.memory_space<vmem>>, vector<1x96xf32>
    %c0_5 = arith.constant 0 : index
    %c0_6 = arith.constant 0 : index
    %3 = vector.load %arg4[%c0_5, %c0_6] : memref<32x32xf32, #tpu.memory_space<vmem>>, vector<32x32xf32>
    %c0_7 = arith.constant 0 : index
    %c0_8 = arith.constant 0 : index
    %4 = vector.load %arg5[%c0_7, %c0_8] : memref<1x32xf32, #tpu.memory_space<vmem>>, vector<1x32xf32>
    %cst = arith.constant dense<0.000000e+00> : vector<16x96xf32>
    %5 = tpu.matmul %0, %1, %cst {dimension_numbers = #tpu.dot_dimension_numbers<[1], [0], [0], [1], [0, 0, 1, 1], [], []>} : vector<16x32xf32>, vector<32x96xf32>, vector<16x96xf32> -> vector<16x96xf32>
    %6 = vector.broadcast %2 : vector<1x96xf32> to vector<16x96xf32>
    %7 = arith.addf %5, %6 : vector<16x96xf32>
    %8 = vector.extract_strided_slice %7 {offsets = [0, 0], sizes = [16, 32], strides = [1, 1]} : vector<16x96xf32> to vector<16x32xf32>
    %9 = vector.extract_strided_slice %7 {offsets = [0, 32], sizes = [16, 32], strides = [1, 1]} : vector<16x96xf32> to vector<16x32xf32>
    %10 = vector.extract_strided_slice %7 {offsets = [0, 64], sizes = [16, 32], strides = [1, 1]} : vector<16x96xf32> to vector<16x32xf32>
    %11 = tpu.iota {dimensions = array<i32: 0>} : vector<8x8xi32>
    %12 = tpu.iota {dimensions = array<i32: 1>} : vector<8x8xi32>
    %13 = vector.extract_strided_slice %8 {offsets = [0, 0], sizes = [8, 16], strides = [1, 1]} : vector<16x32xf32> to vector<8x16xf32>
    %14 = vector.extract_strided_slice %9 {offsets = [0, 0], sizes = [8, 16], strides = [1, 1]} : vector<16x32xf32> to vector<8x16xf32>
    %15 = vector.extract_strided_slice %10 {offsets = [0, 0], sizes = [8, 16], strides = [1, 1]} : vector<16x32xf32> to vector<8x16xf32>
    %cst_9 = arith.constant dense<0.000000e+00> : vector<8x8xf32>
    %16 = tpu.matmul %13, %14, %cst_9 {dimension_numbers = #tpu.dot_dimension_numbers<[1], [1], [0], [0], [0, 0, 1, 0], [], []>} : vector<8x16xf32>, vector<8x16xf32>, vector<8x8xf32> -> vector<8x8xf32>
    %cst_10 = arith.constant 2.500000e-01 : f32
    %17 = vector.broadcast %cst_10 : f32 to vector<8x8xf32>
    %18 = arith.mulf %16, %17 : vector<8x8xf32>
    %19 = arith.cmpi sle, %12, %11 : vector<8x8xi32>
    %cst_11 = arith.constant -1.000000e+30 : f32
    %20 = vector.broadcast %cst_11 : f32 to vector<8x8xf32>
    %21 = arith.select %19, %18, %20 : vector<8x8xi1>, vector<8x8xf32>
    %cst_12 = arith.constant dense<0xFF800000> : vector<8xf32>
    %22 = vector.multi_reduction <maximumf>, %21, %cst_12 [1] : vector<8x8xf32> to vector<8xf32>
    %23 = vector.shape_cast %22 : vector<8xf32> to vector<8x1xf32>
    %24 = vector.broadcast %23 : vector<8x1xf32> to vector<8x8xf32>
    %25 = arith.subf %21, %24 : vector<8x8xf32>
    %26 = math.exp %25 : vector<8x8xf32>
    %cst_13 = arith.constant dense<0.000000e+00> : vector<8xf32>
    %27 = vector.multi_reduction <add>, %26, %cst_13 [1] : vector<8x8xf32> to vector<8xf32>
    %28 = vector.shape_cast %27 : vector<8xf32> to vector<8x1xf32>
    %29 = vector.broadcast %28 : vector<8x1xf32> to vector<8x8xf32>
    %30 = arith.divf %26, %29 : vector<8x8xf32>
    %cst_14 = arith.constant dense<0.000000e+00> : vector<8x16xf32>
    %31 = tpu.matmul %30, %15, %cst_14 {dimension_numbers = #tpu.dot_dimension_numbers<[1], [0], [0], [1], [0, 0, 1, 1], [], []>} : vector<8x8xf32>, vector<8x16xf32>, vector<8x16xf32> -> vector<8x16xf32>
    %32 = vector.extract_strided_slice %8 {offsets = [0, 16], sizes = [8, 16], strides = [1, 1]} : vector<16x32xf32> to vector<8x16xf32>
    %33 = vector.extract_strided_slice %9 {offsets = [0, 16], sizes = [8, 16], strides = [1, 1]} : vector<16x32xf32> to vector<8x16xf32>
    %34 = vector.extract_strided_slice %10 {offsets = [0, 16], sizes = [8, 16], strides = [1, 1]} : vector<16x32xf32> to vector<8x16xf32>
    %cst_15 = arith.constant dense<0.000000e+00> : vector<8x8xf32>
    %35 = tpu.matmul %32, %33, %cst_15 {dimension_numbers = #tpu.dot_dimension_numbers<[1], [1], [0], [0], [0, 0, 1, 0], [], []>} : vector<8x16xf32>, vector<8x16xf32>, vector<8x8xf32> -> vector<8x8xf32>
    %cst_16 = arith.constant 2.500000e-01 : f32
    %36 = vector.broadcast %cst_16 : f32 to vector<8x8xf32>
    %37 = arith.mulf %35, %36 : vector<8x8xf32>
    %38 = arith.cmpi sle, %12, %11 : vector<8x8xi32>
    %cst_17 = arith.constant -1.000000e+30 : f32
    %39 = vector.broadcast %cst_17 : f32 to vector<8x8xf32>
    %40 = arith.select %38, %37, %39 : vector<8x8xi1>, vector<8x8xf32>
    %cst_18 = arith.constant dense<0xFF800000> : vector<8xf32>
    %41 = vector.multi_reduction <maximumf>, %40, %cst_18 [1] : vector<8x8xf32> to vector<8xf32>
    %42 = vector.shape_cast %41 : vector<8xf32> to vector<8x1xf32>
    %43 = vector.broadcast %42 : vector<8x1xf32> to vector<8x8xf32>
    %44 = arith.subf %40, %43 : vector<8x8xf32>
    %45 = math.exp %44 : vector<8x8xf32>
    %cst_19 = arith.constant dense<0.000000e+00> : vector<8xf32>
    %46 = vector.multi_reduction <add>, %45, %cst_19 [1] : vector<8x8xf32> to vector<8xf32>
    %47 = vector.shape_cast %46 : vector<8xf32> to vector<8x1xf32>
    %48 = vector.broadcast %47 : vector<8x1xf32> to vector<8x8xf32>
    %49 = arith.divf %45, %48 : vector<8x8xf32>
    %cst_20 = arith.constant dense<0.000000e+00> : vector<8x16xf32>
    %50 = tpu.matmul %49, %34, %cst_20 {dimension_numbers = #tpu.dot_dimension_numbers<[1], [0], [0], [1], [0, 0, 1, 1], [], []>} : vector<8x8xf32>, vector<8x16xf32>, vector<8x16xf32> -> vector<8x16xf32>
    %51 = tpu.concatenate %31, %50 in 1 : vector<8x16xf32>, vector<8x16xf32> -> vector<8x32xf32>
    %52 = vector.extract_strided_slice %8 {offsets = [8, 0], sizes = [8, 16], strides = [1, 1]} : vector<16x32xf32> to vector<8x16xf32>
    %53 = vector.extract_strided_slice %9 {offsets = [8, 0], sizes = [8, 16], strides = [1, 1]} : vector<16x32xf32> to vector<8x16xf32>
    %54 = vector.extract_strided_slice %10 {offsets = [8, 0], sizes = [8, 16], strides = [1, 1]} : vector<16x32xf32> to vector<8x16xf32>
    %cst_21 = arith.constant dense<0.000000e+00> : vector<8x8xf32>
    %55 = tpu.matmul %52, %53, %cst_21 {dimension_numbers = #tpu.dot_dimension_numbers<[1], [1], [0], [0], [0, 0, 1, 0], [], []>} : vector<8x16xf32>, vector<8x16xf32>, vector<8x8xf32> -> vector<8x8xf32>
    %cst_22 = arith.constant 2.500000e-01 : f32
    %56 = vector.broadcast %cst_22 : f32 to vector<8x8xf32>
    %57 = arith.mulf %55, %56 : vector<8x8xf32>
    %58 = arith.cmpi sle, %12, %11 : vector<8x8xi32>
    %cst_23 = arith.constant -1.000000e+30 : f32
    %59 = vector.broadcast %cst_23 : f32 to vector<8x8xf32>
    %60 = arith.select %58, %57, %59 : vector<8x8xi1>, vector<8x8xf32>
    %cst_24 = arith.constant dense<0xFF800000> : vector<8xf32>
    %61 = vector.multi_reduction <maximumf>, %60, %cst_24 [1] : vector<8x8xf32> to vector<8xf32>
    %62 = vector.shape_cast %61 : vector<8xf32> to vector<8x1xf32>
    %63 = vector.broadcast %62 : vector<8x1xf32> to vector<8x8xf32>
    %64 = arith.subf %60, %63 : vector<8x8xf32>
    %65 = math.exp %64 : vector<8x8xf32>
    %cst_25 = arith.constant dense<0.000000e+00> : vector<8xf32>
    %66 = vector.multi_reduction <add>, %65, %cst_25 [1] : vector<8x8xf32> to vector<8xf32>
    %67 = vector.shape_cast %66 : vector<8xf32> to vector<8x1xf32>
    %68 = vector.broadcast %67 : vector<8x1xf32> to vector<8x8xf32>
    %69 = arith.divf %65, %68 : vector<8x8xf32>
    %cst_26 = arith.constant dense<0.000000e+00> : vector<8x16xf32>
    %70 = tpu.matmul %69, %54, %cst_26 {dimension_numbers = #tpu.dot_dimension_numbers<[1], [0], [0], [1], [0, 0, 1, 1], [], []>} : vector<8x8xf32>, vector<8x16xf32>, vector<8x16xf32> -> vector<8x16xf32>
    %71 = vector.extract_strided_slice %8 {offsets = [8, 16], sizes = [8, 16], strides = [1, 1]} : vector<16x32xf32> to vector<8x16xf32>
    %72 = vector.extract_strided_slice %9 {offsets = [8, 16], sizes = [8, 16], strides = [1, 1]} : vector<16x32xf32> to vector<8x16xf32>
    %73 = vector.extract_strided_slice %10 {offsets = [8, 16], sizes = [8, 16], strides = [1, 1]} : vector<16x32xf32> to vector<8x16xf32>
    %cst_27 = arith.constant dense<0.000000e+00> : vector<8x8xf32>
    %74 = tpu.matmul %71, %72, %cst_27 {dimension_numbers = #tpu.dot_dimension_numbers<[1], [1], [0], [0], [0, 0, 1, 0], [], []>} : vector<8x16xf32>, vector<8x16xf32>, vector<8x8xf32> -> vector<8x8xf32>
    %cst_28 = arith.constant 2.500000e-01 : f32
    %75 = vector.broadcast %cst_28 : f32 to vector<8x8xf32>
    %76 = arith.mulf %74, %75 : vector<8x8xf32>
    %77 = arith.cmpi sle, %12, %11 : vector<8x8xi32>
    %cst_29 = arith.constant -1.000000e+30 : f32
    %78 = vector.broadcast %cst_29 : f32 to vector<8x8xf32>
    %79 = arith.select %77, %76, %78 : vector<8x8xi1>, vector<8x8xf32>
    %cst_30 = arith.constant dense<0xFF800000> : vector<8xf32>
    %80 = vector.multi_reduction <maximumf>, %79, %cst_30 [1] : vector<8x8xf32> to vector<8xf32>
    %81 = vector.shape_cast %80 : vector<8xf32> to vector<8x1xf32>
    %82 = vector.broadcast %81 : vector<8x1xf32> to vector<8x8xf32>
    %83 = arith.subf %79, %82 : vector<8x8xf32>
    %84 = math.exp %83 : vector<8x8xf32>
    %cst_31 = arith.constant dense<0.000000e+00> : vector<8xf32>
    %85 = vector.multi_reduction <add>, %84, %cst_31 [1] : vector<8x8xf32> to vector<8xf32>
    %86 = vector.shape_cast %85 : vector<8xf32> to vector<8x1xf32>
    %87 = vector.broadcast %86 : vector<8x1xf32> to vector<8x8xf32>
    %88 = arith.divf %84, %87 : vector<8x8xf32>
    %cst_32 = arith.constant dense<0.000000e+00> : vector<8x16xf32>
    %89 = tpu.matmul %88, %73, %cst_32 {dimension_numbers = #tpu.dot_dimension_numbers<[1], [0], [0], [1], [0, 0, 1, 1], [], []>} : vector<8x8xf32>, vector<8x16xf32>, vector<8x16xf32> -> vector<8x16xf32>
    %90 = tpu.concatenate %70, %89 in 1 : vector<8x16xf32>, vector<8x16xf32> -> vector<8x32xf32>
    %91 = tpu.concatenate %51, %90 in 0 : vector<8x32xf32>, vector<8x32xf32> -> vector<16x32xf32>
    %cst_33 = arith.constant dense<0.000000e+00> : vector<16x32xf32>
    %92 = tpu.matmul %91, %3, %cst_33 {dimension_numbers = #tpu.dot_dimension_numbers<[1], [0], [0], [1], [0, 0, 1, 1], [], []>} : vector<16x32xf32>, vector<32x32xf32>, vector<16x32xf32> -> vector<16x32xf32>
    %93 = vector.broadcast %4 : vector<1x32xf32> to vector<16x32xf32>
    %94 = arith.addf %92, %93 : vector<16x32xf32>
    %95 = arith.addf %0, %94 : vector<16x32xf32>
    %c0_34 = arith.constant 0 : index
    %c0_35 = arith.constant 0 : index
    %96 = vector.load %arg6[%c0_34, %c0_35] : memref<1x32xf32, #tpu.memory_space<vmem>>, vector<1x32xf32>
    %c0_36 = arith.constant 0 : index
    %c0_37 = arith.constant 0 : index
    %97 = vector.load %arg7[%c0_36, %c0_37] : memref<1x32xf32, #tpu.memory_space<vmem>>, vector<1x32xf32>
    %cst_38 = arith.constant dense<0.000000e+00> : vector<16xf32>
    %98 = vector.multi_reduction <add>, %95, %cst_38 [1] : vector<16x32xf32> to vector<16xf32>
    %99 = vector.shape_cast %98 : vector<16xf32> to vector<16x1xf32>
    %cst_39 = arith.constant 3.200000e+01 : f32
    %100 = vector.broadcast %cst_39 : f32 to vector<16x1xf32>
    %101 = arith.divf %99, %100 : vector<16x1xf32>
    %102 = vector.broadcast %101 : vector<16x1xf32> to vector<16x32xf32>
    %103 = arith.subf %95, %102 : vector<16x32xf32>
    %104 = arith.mulf %103, %103 : vector<16x32xf32>
    %cst_40 = arith.constant dense<0.000000e+00> : vector<16xf32>
    %105 = vector.multi_reduction <add>, %104, %cst_40 [1] : vector<16x32xf32> to vector<16xf32>
    %106 = vector.shape_cast %105 : vector<16xf32> to vector<16x1xf32>
    %cst_41 = arith.constant 3.200000e+01 : f32
    %107 = vector.broadcast %cst_41 : f32 to vector<16x1xf32>
    %108 = arith.divf %106, %107 : vector<16x1xf32>
    %cst_42 = arith.constant 9.99999974E-6 : f32
    %109 = vector.broadcast %cst_42 : f32 to vector<16x1xf32>
    %110 = arith.addf %108, %109 : vector<16x1xf32>
    %111 = math.rsqrt %110 : vector<16x1xf32>
    %112 = vector.broadcast %111 : vector<16x1xf32> to vector<16x32xf32>
    %113 = arith.mulf %103, %112 : vector<16x32xf32>
    %114 = vector.broadcast %96 : vector<1x32xf32> to vector<16x32xf32>
    %115 = arith.mulf %113, %114 : vector<16x32xf32>
    %116 = vector.broadcast %97 : vector<1x32xf32> to vector<16x32xf32>
    %117 = arith.addf %115, %116 : vector<16x32xf32>
    %c0_43 = arith.constant 0 : index
    %c0_44 = arith.constant 0 : index
    %118 = vector.load %arg10[%c0_43, %c0_44] : memref<32x64xf32, #tpu.memory_space<vmem>>, vector<32x64xf32>
    %cst_45 = arith.constant dense<0.000000e+00> : vector<16x64xf32>
    %119 = tpu.matmul %117, %118, %cst_45 {dimension_numbers = #tpu.dot_dimension_numbers<[1], [0], [0], [1], [0, 0, 1, 1], [], []>} : vector<16x32xf32>, vector<32x64xf32>, vector<16x64xf32> -> vector<16x64xf32>
    %c0_46 = arith.constant 0 : index
    %c0_47 = arith.constant 0 : index
    %120 = vector.load %arg11[%c0_46, %c0_47] : memref<1x64xf32, #tpu.memory_space<vmem>>, vector<1x64xf32>
    %121 = vector.broadcast %120 : vector<1x64xf32> to vector<16x64xf32>
    %122 = arith.addf %119, %121 : vector<16x64xf32>
    %cst_48 = arith.constant 0.000000e+00 : f32
    %123 = vector.broadcast %cst_48 : f32 to vector<16x64xf32>
    %124 = arith.maximumf %122, %123 : vector<16x64xf32>
    %c0_49 = arith.constant 0 : index
    %c0_50 = arith.constant 0 : index
    %125 = vector.load %arg12[%c0_49, %c0_50] : memref<64x32xf32, #tpu.memory_space<vmem>>, vector<64x32xf32>
    %cst_51 = arith.constant dense<0.000000e+00> : vector<16x32xf32>
    %126 = tpu.matmul %124, %125, %cst_51 {dimension_numbers = #tpu.dot_dimension_numbers<[1], [0], [0], [1], [0, 0, 1, 1], [], []>} : vector<16x64xf32>, vector<64x32xf32>, vector<16x32xf32> -> vector<16x32xf32>
    %c0_52 = arith.constant 0 : index
    %c0_53 = arith.constant 0 : index
    %127 = vector.load %arg13[%c0_52, %c0_53] : memref<1x32xf32, #tpu.memory_space<vmem>>, vector<1x32xf32>
    %128 = vector.broadcast %127 : vector<1x32xf32> to vector<16x32xf32>
    %129 = arith.addf %126, %128 : vector<16x32xf32>
    %130 = arith.addf %117, %129 : vector<16x32xf32>
    %c0_54 = arith.constant 0 : index
    %c0_55 = arith.constant 0 : index
    %131 = vector.load %arg8[%c0_54, %c0_55] : memref<1x32xf32, #tpu.memory_space<vmem>>, vector<1x32xf32>
    %c0_56 = arith.constant 0 : index
    %c0_57 = arith.constant 0 : index
    %132 = vector.load %arg9[%c0_56, %c0_57] : memref<1x32xf32, #tpu.memory_space<vmem>>, vector<1x32xf32>
    %cst_58 = arith.constant dense<0.000000e+00> : vector<16xf32>
    %133 = vector.multi_reduction <add>, %130, %cst_58 [1] : vector<16x32xf32> to vector<16xf32>
    %134 = vector.shape_cast %133 : vector<16xf32> to vector<16x1xf32>
    %cst_59 = arith.constant 3.200000e+01 : f32
    %135 = vector.broadcast %cst_59 : f32 to vector<16x1xf32>
    %136 = arith.divf %134, %135 : vector<16x1xf32>
    %137 = vector.broadcast %136 : vector<16x1xf32> to vector<16x32xf32>
    %138 = arith.subf %130, %137 : vector<16x32xf32>
    %139 = arith.mulf %138, %138 : vector<16x32xf32>
    %cst_60 = arith.constant dense<0.000000e+00> : vector<16xf32>
    %140 = vector.multi_reduction <add>, %139, %cst_60 [1] : vector<16x32xf32> to vector<16xf32>
    %141 = vector.shape_cast %140 : vector<16xf32> to vector<16x1xf32>
    %cst_61 = arith.constant 3.200000e+01 : f32
    %142 = vector.broadcast %cst_61 : f32 to vector<16x1xf32>
    %143 = arith.divf %141, %142 : vector<16x1xf32>
    %cst_62 = arith.constant 9.99999974E-6 : f32
    %144 = vector.broadcast %cst_62 : f32 to vector<16x1xf32>
    %145 = arith.addf %143, %144 : vector<16x1xf32>
    %146 = math.rsqrt %145 : vector<16x1xf32>
    %147 = vector.broadcast %146 : vector<16x1xf32> to vector<16x32xf32>
    %148 = arith.mulf %138, %147 : vector<16x32xf32>
    %149 = vector.broadcast %131 : vector<1x32xf32> to vector<16x32xf32>
    %150 = arith.mulf %148, %149 : vector<16x32xf32>
    %151 = vector.broadcast %132 : vector<1x32xf32> to vector<16x32xf32>
    %152 = arith.addf %150, %151 : vector<16x32xf32>
    %c0_63 = arith.constant 0 : index
    %c0_64 = arith.constant 0 : index
    %153 = vector.load %arg14[%c0_63, %c0_64] : memref<32x96xf32, #tpu.memory_space<vmem>>, vector<32x96xf32>
    %c0_65 = arith.constant 0 : index
    %c0_66 = arith.constant 0 : index
    %154 = vector.load %arg15[%c0_65, %c0_66] : memref<1x96xf32, #tpu.memory_space<vmem>>, vector<1x96xf32>
    %c0_67 = arith.constant 0 : index
    %c0_68 = arith.constant 0 : index
    %155 = vector.load %arg16[%c0_67, %c0_68] : memref<32x32xf32, #tpu.memory_space<vmem>>, vector<32x32xf32>
    %c0_69 = arith.constant 0 : index
    %c0_70 = arith.constant 0 : index
    %156 = vector.load %arg17[%c0_69, %c0_70] : memref<1x32xf32, #tpu.memory_space<vmem>>, vector<1x32xf32>
    %cst_71 = arith.constant dense<0.000000e+00> : vector<16x96xf32>
    %157 = tpu.matmul %152, %153, %cst_71 {dimension_numbers = #tpu.dot_dimension_numbers<[1], [0], [0], [1], [0, 0, 1, 1], [], []>} : vector<16x32xf32>, vector<32x96xf32>, vector<16x96xf32> -> vector<16x96xf32>
    %158 = vector.broadcast %154 : vector<1x96xf32> to vector<16x96xf32>
    %159 = arith.addf %157, %158 : vector<16x96xf32>
    %160 = vector.extract_strided_slice %159 {offsets = [0, 0], sizes = [16, 32], strides = [1, 1]} : vector<16x96xf32> to vector<16x32xf32>
    %161 = vector.extract_strided_slice %159 {offsets = [0, 32], sizes = [16, 32], strides = [1, 1]} : vector<16x96xf32> to vector<16x32xf32>
    %162 = vector.extract_strided_slice %159 {offsets = [0, 64], sizes = [16, 32], strides = [1, 1]} : vector<16x96xf32> to vector<16x32xf32>
    %163 = tpu.iota {dimensions = array<i32: 0>} : vector<8x8xi32>
    %164 = tpu.iota {dimensions = array<i32: 1>} : vector<8x8xi32>
    %165 = vector.extract_strided_slice %160 {offsets = [0, 0], sizes = [8, 16], strides = [1, 1]} : vector<16x32xf32> to vector<8x16xf32>
    %166 = vector.extract_strided_slice %161 {offsets = [0, 0], sizes = [8, 16], strides = [1, 1]} : vector<16x32xf32> to vector<8x16xf32>
    %167 = vector.extract_strided_slice %162 {offsets = [0, 0], sizes = [8, 16], strides = [1, 1]} : vector<16x32xf32> to vector<8x16xf32>
    %cst_72 = arith.constant dense<0.000000e+00> : vector<8x8xf32>
    %168 = tpu.matmul %165, %166, %cst_72 {dimension_numbers = #tpu.dot_dimension_numbers<[1], [1], [0], [0], [0, 0, 1, 0], [], []>} : vector<8x16xf32>, vector<8x16xf32>, vector<8x8xf32> -> vector<8x8xf32>
    %cst_73 = arith.constant 2.500000e-01 : f32
    %169 = vector.broadcast %cst_73 : f32 to vector<8x8xf32>
    %170 = arith.mulf %168, %169 : vector<8x8xf32>
    %171 = arith.cmpi sle, %164, %163 : vector<8x8xi32>
    %cst_74 = arith.constant -1.000000e+30 : f32
    %172 = vector.broadcast %cst_74 : f32 to vector<8x8xf32>
    %173 = arith.select %171, %170, %172 : vector<8x8xi1>, vector<8x8xf32>
    %cst_75 = arith.constant dense<0xFF800000> : vector<8xf32>
    %174 = vector.multi_reduction <maximumf>, %173, %cst_75 [1] : vector<8x8xf32> to vector<8xf32>
    %175 = vector.shape_cast %174 : vector<8xf32> to vector<8x1xf32>
    %176 = vector.broadcast %175 : vector<8x1xf32> to vector<8x8xf32>
    %177 = arith.subf %173, %176 : vector<8x8xf32>
    %178 = math.exp %177 : vector<8x8xf32>
    %cst_76 = arith.constant dense<0.000000e+00> : vector<8xf32>
    %179 = vector.multi_reduction <add>, %178, %cst_76 [1] : vector<8x8xf32> to vector<8xf32>
    %180 = vector.shape_cast %179 : vector<8xf32> to vector<8x1xf32>
    %181 = vector.broadcast %180 : vector<8x1xf32> to vector<8x8xf32>
    %182 = arith.divf %178, %181 : vector<8x8xf32>
    %cst_77 = arith.constant dense<0.000000e+00> : vector<8x16xf32>
    %183 = tpu.matmul %182, %167, %cst_77 {dimension_numbers = #tpu.dot_dimension_numbers<[1], [0], [0], [1], [0, 0, 1, 1], [], []>} : vector<8x8xf32>, vector<8x16xf32>, vector<8x16xf32> -> vector<8x16xf32>
    %184 = vector.extract_strided_slice %160 {offsets = [0, 16], sizes = [8, 16], strides = [1, 1]} : vector<16x32xf32> to vector<8x16xf32>
    %185 = vector.extract_strided_slice %161 {offsets = [0, 16], sizes = [8, 16], strides = [1, 1]} : vector<16x32xf32> to vector<8x16xf32>
    %186 = vector.extract_strided_slice %162 {offsets = [0, 16], sizes = [8, 16], strides = [1, 1]} : vector<16x32xf32> to vector<8x16xf32>
    %cst_78 = arith.constant dense<0.000000e+00> : vector<8x8xf32>
    %187 = tpu.matmul %184, %185, %cst_78 {dimension_numbers = #tpu.dot_dimension_numbers<[1], [1], [0], [0], [0, 0, 1, 0], [], []>} : vector<8x16xf32>, vector<8x16xf32>, vector<8x8xf32> -> vector<8x8xf32>
    %cst_79 = arith.constant 2.500000e-01 : f32
    %188 = vector.broadcast %cst_79 : f32 to vector<8x8xf32>
    %189 = arith.mulf %187, %188 : vector<8x8xf32>
    %190 = arith.cmpi sle, %164, %163 : vector<8x8xi32>
    %cst_80 = arith.constant -1.000000e+30 : f32
    %191 = vector.broadcast %cst_80 : f32 to vector<8x8xf32>
    %192 = arith.select %190, %189, %191 : vector<8x8xi1>, vector<8x8xf32>
    %cst_81 = arith.constant dense<0xFF800000> : vector<8xf32>
    %193 = vector.multi_reduction <maximumf>, %192, %cst_81 [1] : vector<8x8xf32> to vector<8xf32>
    %194 = vector.shape_cast %193 : vector<8xf32> to vector<8x1xf32>
    %195 = vector.broadcast %194 : vector<8x1xf32> to vector<8x8xf32>
    %196 = arith.subf %192, %195 : vector<8x8xf32>
    %197 = math.exp %196 : vector<8x8xf32>
    %cst_82 = arith.constant dense<0.000000e+00> : vector<8xf32>
    %198 = vector.multi_reduction <add>, %197, %cst_82 [1] : vector<8x8xf32> to vector<8xf32>
    %199 = vector.shape_cast %198 : vector<8xf32> to vector<8x1xf32>
    %200 = vector.broadcast %199 : vector<8x1xf32> to vector<8x8xf32>
    %201 = arith.divf %197, %200 : vector<8x8xf32>
    %cst_83 = arith.constant dense<0.000000e+00> : vector<8x16xf32>
    %202 = tpu.matmul %201, %186, %cst_83 {dimension_numbers = #tpu.dot_dimension_numbers<[1], [0], [0], [1], [0, 0, 1, 1], [], []>} : vector<8x8xf32>, vector<8x16xf32>, vector<8x16xf32> -> vector<8x16xf32>
    %203 = tpu.concatenate %183, %202 in 1 : vector<8x16xf32>, vector<8x16xf32> -> vector<8x32xf32>
    %204 = vector.extract_strided_slice %160 {offsets = [8, 0], sizes = [8, 16], strides = [1, 1]} : vector<16x32xf32> to vector<8x16xf32>
    %205 = vector.extract_strided_slice %161 {offsets = [8, 0], sizes = [8, 16], strides = [1, 1]} : vector<16x32xf32> to vector<8x16xf32>
    %206 = vector.extract_strided_slice %162 {offsets = [8, 0], sizes = [8, 16], strides = [1, 1]} : vector<16x32xf32> to vector<8x16xf32>
    %cst_84 = arith.constant dense<0.000000e+00> : vector<8x8xf32>
    %207 = tpu.matmul %204, %205, %cst_84 {dimension_numbers = #tpu.dot_dimension_numbers<[1], [1], [0], [0], [0, 0, 1, 0], [], []>} : vector<8x16xf32>, vector<8x16xf32>, vector<8x8xf32> -> vector<8x8xf32>
    %cst_85 = arith.constant 2.500000e-01 : f32
    %208 = vector.broadcast %cst_85 : f32 to vector<8x8xf32>
    %209 = arith.mulf %207, %208 : vector<8x8xf32>
    %210 = arith.cmpi sle, %164, %163 : vector<8x8xi32>
    %cst_86 = arith.constant -1.000000e+30 : f32
    %211 = vector.broadcast %cst_86 : f32 to vector<8x8xf32>
    %212 = arith.select %210, %209, %211 : vector<8x8xi1>, vector<8x8xf32>
    %cst_87 = arith.constant dense<0xFF800000> : vector<8xf32>
    %213 = vector.multi_reduction <maximumf>, %212, %cst_87 [1] : vector<8x8xf32> to vector<8xf32>
    %214 = vector.shape_cast %213 : vector<8xf32> to vector<8x1xf32>
    %215 = vector.broadcast %214 : vector<8x1xf32> to vector<8x8xf32>
    %216 = arith.subf %212, %215 : vector<8x8xf32>
    %217 = math.exp %216 : vector<8x8xf32>
    %cst_88 = arith.constant dense<0.000000e+00> : vector<8xf32>
    %218 = vector.multi_reduction <add>, %217, %cst_88 [1] : vector<8x8xf32> to vector<8xf32>
    %219 = vector.shape_cast %218 : vector<8xf32> to vector<8x1xf32>
    %220 = vector.broadcast %219 : vector<8x1xf32> to vector<8x8xf32>
    %221 = arith.divf %217, %220 : vector<8x8xf32>
    %cst_89 = arith.constant dense<0.000000e+00> : vector<8x16xf32>
    %222 = tpu.matmul %221, %206, %cst_89 {dimension_numbers = #tpu.dot_dimension_numbers<[1], [0], [0], [1], [0, 0, 1, 1], [], []>} : vector<8x8xf32>, vector<8x16xf32>, vector<8x16xf32> -> vector<8x16xf32>
    %223 = vector.extract_strided_slice %160 {offsets = [8, 16], sizes = [8, 16], strides = [1, 1]} : vector<16x32xf32> to vector<8x16xf32>
    %224 = vector.extract_strided_slice %161 {offsets = [8, 16], sizes = [8, 16], strides = [1, 1]} : vector<16x32xf32> to vector<8x16xf32>
    %225 = vector.extract_strided_slice %162 {offsets = [8, 16], sizes = [8, 16], strides = [1, 1]} : vector<16x32xf32> to vector<8x16xf32>
    %cst_90 = arith.constant dense<0.000000e+00> : vector<8x8xf32>
    %226 = tpu.matmul %223, %224, %cst_90 {dimension_numbers = #tpu.dot_dimension_numbers<[1], [1], [0], [0], [0, 0, 1, 0], [], []>} : vector<8x16xf32>, vector<8x16xf32>, vector<8x8xf32> -> vector<8x8xf32>
    %cst_91 = arith.constant 2.500000e-01 : f32
    %227 = vector.broadcast %cst_91 : f32 to vector<8x8xf32>
    %228 = arith.mulf %226, %227 : vector<8x8xf32>
    %229 = arith.cmpi sle, %164, %163 : vector<8x8xi32>
    %cst_92 = arith.constant -1.000000e+30 : f32
    %230 = vector.broadcast %cst_92 : f32 to vector<8x8xf32>
    %231 = arith.select %229, %228, %230 : vector<8x8xi1>, vector<8x8xf32>
    %cst_93 = arith.constant dense<0xFF800000> : vector<8xf32>
    %232 = vector.multi_reduction <maximumf>, %231, %cst_93 [1] : vector<8x8xf32> to vector<8xf32>
    %233 = vector.shape_cast %232 : vector<8xf32> to vector<8x1xf32>
    %234 = vector.broadcast %233 : vector<8x1xf32> to vector<8x8xf32>
    %235 = arith.subf %231, %234 : vector<8x8xf32>
    %236 = math.exp %235 : vector<8x8xf32>
    %cst_94 = arith.constant dense<0.000000e+00> : vector<8xf32>
    %237 = vector.multi_reduction <add>, %236, %cst_94 [1] : vector<8x8xf32> to vector<8xf32>
    %238 = vector.shape_cast %237 : vector<8xf32> to vector<8x1xf32>
    %239 = vector.broadcast %238 : vector<8x1xf32> to vector<8x8xf32>
    %240 = arith.divf %236, %239 : vector<8x8xf32>
    %cst_95 = arith.constant dense<0.000000e+00> : vector<8x16xf32>
    %241 = tpu.matmul %240, %225, %cst_95 {dimension_numbers = #tpu.dot_dimension_numbers<[1], [0], [0], [1], [0, 0, 1, 1], [], []>} : vector<8x8xf32>, vector<8x16xf32>, vector<8x16xf32> -> vector<8x16xf32>
    %242 = tpu.concatenate %222, %241 in 1 : vector<8x16xf32>, vector<8x16xf32> -> vector<8x32xf32>
    %243 = tpu.concatenate %203, %242 in 0 : vector<8x32xf32>, vector<8x32xf32> -> vector<16x32xf32>
    %cst_96 = arith.constant dense<0.000000e+00> : vector<16x32xf32>
    %244 = tpu.matmul %243, %155, %cst_96 {dimension_numbers = #tpu.dot_dimension_numbers<[1], [0], [0], [1], [0, 0, 1, 1], [], []>} : vector<16x32xf32>, vector<32x32xf32>, vector<16x32xf32> -> vector<16x32xf32>
    %245 = vector.broadcast %156 : vector<1x32xf32> to vector<16x32xf32>
    %246 = arith.addf %244, %245 : vector<16x32xf32>
    %247 = arith.addf %152, %246 : vector<16x32xf32>
    %c0_97 = arith.constant 0 : index
    %c0_98 = arith.constant 0 : index
    %248 = vector.load %arg18[%c0_97, %c0_98] : memref<1x32xf32, #tpu.memory_space<vmem>>, vector<1x32xf32>
    %c0_99 = arith.constant 0 : index
    %c0_100 = arith.constant 0 : index
    %249 = vector.load %arg19[%c0_99, %c0_100] : memref<1x32xf32, #tpu.memory_space<vmem>>, vector<1x32xf32>
    %cst_101 = arith.constant dense<0.000000e+00> : vector<16xf32>
    %250 = vector.multi_reduction <add>, %247, %cst_101 [1] : vector<16x32xf32> to vector<16xf32>
    %251 = vector.shape_cast %250 : vector<16xf32> to vector<16x1xf32>
    %cst_102 = arith.constant 3.200000e+01 : f32
    %252 = vector.broadcast %cst_102 : f32 to vector<16x1xf32>
    %253 = arith.divf %251, %252 : vector<16x1xf32>
    %254 = vector.broadcast %253 : vector<16x1xf32> to vector<16x32xf32>
    %255 = arith.subf %247, %254 : vector<16x32xf32>
    %256 = arith.mulf %255, %255 : vector<16x32xf32>
    %cst_103 = arith.constant dense<0.000000e+00> : vector<16xf32>
    %257 = vector.multi_reduction <add>, %256, %cst_103 [1] : vector<16x32xf32> to vector<16xf32>
    %258 = vector.shape_cast %257 : vector<16xf32> to vector<16x1xf32>
    %cst_104 = arith.constant 3.200000e+01 : f32
    %259 = vector.broadcast %cst_104 : f32 to vector<16x1xf32>
    %260 = arith.divf %258, %259 : vector<16x1xf32>
    %cst_105 = arith.constant 9.99999974E-6 : f32
    %261 = vector.broadcast %cst_105 : f32 to vector<16x1xf32>
    %262 = arith.addf %260, %261 : vector<16x1xf32>
    %263 = math.rsqrt %262 : vector<16x1xf32>
    %264 = vector.broadcast %263 : vector<16x1xf32> to vector<16x32xf32>
    %265 = arith.mulf %255, %264 : vector<16x32xf32>
    %266 = vector.broadcast %248 : vector<1x32xf32> to vector<16x32xf32>
    %267 = arith.mulf %265, %266 : vector<16x32xf32>
    %268 = vector.broadcast %249 : vector<1x32xf32> to vector<16x32xf32>
    %269 = arith.addf %267, %268 : vector<16x32xf32>
    %c0_106 = arith.constant 0 : index
    %c0_107 = arith.constant 0 : index
    %270 = vector.load %arg22[%c0_106, %c0_107] : memref<32x4xf32, #tpu.memory_space<vmem>>, vector<32x4xf32>
    %cst_108 = arith.constant dense<0.000000e+00> : vector<16x4xf32>
    %271 = tpu.matmul %269, %270, %cst_108 {dimension_numbers = #tpu.dot_dimension_numbers<[1], [0], [0], [1], [0, 0, 1, 1], [], []>} : vector<16x32xf32>, vector<32x4xf32>, vector<16x4xf32> -> vector<16x4xf32>
    %cst_109 = arith.constant dense<0xFF800000> : vector<16xf32>
    %272 = vector.multi_reduction <maximumf>, %271, %cst_109 [1] : vector<16x4xf32> to vector<16xf32>
    %273 = vector.shape_cast %272 : vector<16xf32> to vector<16x1xf32>
    %274 = vector.broadcast %273 : vector<16x1xf32> to vector<16x4xf32>
    %275 = arith.subf %271, %274 : vector<16x4xf32>
    %276 = math.exp %275 : vector<16x4xf32>
    %cst_110 = arith.constant dense<0.000000e+00> : vector<16xf32>
    %277 = vector.multi_reduction <add>, %276, %cst_110 [1] : vector<16x4xf32> to vector<16xf32>
    %278 = vector.shape_cast %277 : vector<16xf32> to vector<16x1xf32>
    %279 = vector.broadcast %278 : vector<16x1xf32> to vector<16x4xf32>
    %280 = arith.divf %276, %279 : vector<16x4xf32>
    %281 = tpu.iota {dimensions = array<i32: 1>} : vector<16x4xi32>
    %282 = arith.sitofp %281 : vector<16x4xi32> to vector<16x4xf32>
    %cst_111 = arith.constant dense<0xFF800000> : vector<16xf32>
    %283 = vector.multi_reduction <maximumf>, %280, %cst_111 [1] : vector<16x4xf32> to vector<16xf32>
    %284 = vector.shape_cast %283 : vector<16xf32> to vector<16x1xf32>
    %285 = vector.broadcast %284 : vector<16x1xf32> to vector<16x4xf32>
    %286 = arith.cmpf oge, %280, %285 : vector<16x4xf32>
    %cst_112 = arith.constant 4.000000e+00 : f32
    %287 = vector.broadcast %cst_112 : f32 to vector<16x4xf32>
    %288 = arith.select %286, %282, %287 : vector<16x4xi1>, vector<16x4xf32>
    %cst_113 = arith.constant dense<0x7F800000> : vector<16xf32>
    %289 = vector.multi_reduction <minimumf>, %288, %cst_113 [1] : vector<16x4xf32> to vector<16xf32>
    %290 = vector.shape_cast %289 : vector<16xf32> to vector<16x1xf32>
    %291 = vector.broadcast %290 : vector<16x1xf32> to vector<16x4xf32>
    %292 = arith.cmpf oeq, %282, %291 : vector<16x4xf32>
    %293 = arith.extui %292 : vector<16x4xi1> to vector<16x4xi32>
    %294 = arith.sitofp %293 : vector<16x4xi32> to vector<16x4xf32>
    %cst_114 = arith.constant 0.000000e+00 : f32
    %295 = vector.broadcast %cst_114 : f32 to vector<16x4xf32>
    %296 = arith.cmpf ogt, %294, %295 : vector<16x4xf32>
    %cst_115 = arith.constant -1.000000e+30 : f32
    %297 = vector.broadcast %cst_115 : f32 to vector<16x4xf32>
    %298 = arith.select %296, %297, %280 : vector<16x4xi1>, vector<16x4xf32>
    %cst_116 = arith.constant dense<0xFF800000> : vector<16xf32>
    %299 = vector.multi_reduction <maximumf>, %298, %cst_116 [1] : vector<16x4xf32> to vector<16xf32>
    %300 = vector.shape_cast %299 : vector<16xf32> to vector<16x1xf32>
    %301 = vector.broadcast %300 : vector<16x1xf32> to vector<16x4xf32>
    %302 = arith.cmpf oge, %298, %301 : vector<16x4xf32>
    %cst_117 = arith.constant 4.000000e+00 : f32
    %303 = vector.broadcast %cst_117 : f32 to vector<16x4xf32>
    %304 = arith.select %302, %282, %303 : vector<16x4xi1>, vector<16x4xf32>
    %cst_118 = arith.constant dense<0x7F800000> : vector<16xf32>
    %305 = vector.multi_reduction <minimumf>, %304, %cst_118 [1] : vector<16x4xf32> to vector<16xf32>
    %306 = vector.shape_cast %305 : vector<16xf32> to vector<16x1xf32>
    %307 = vector.broadcast %306 : vector<16x1xf32> to vector<16x4xf32>
    %308 = arith.cmpf oeq, %282, %307 : vector<16x4xf32>
    %309 = arith.extui %308 : vector<16x4xi1> to vector<16x4xi32>
    %310 = arith.sitofp %309 : vector<16x4xi32> to vector<16x4xf32>
    %311 = arith.mulf %280, %294 : vector<16x4xf32>
    %cst_119 = arith.constant dense<0.000000e+00> : vector<16xf32>
    %312 = vector.multi_reduction <add>, %311, %cst_119 [1] : vector<16x4xf32> to vector<16xf32>
    %313 = vector.shape_cast %312 : vector<16xf32> to vector<16x1xf32>
    %314 = arith.mulf %280, %310 : vector<16x4xf32>
    %cst_120 = arith.constant dense<0.000000e+00> : vector<16xf32>
    %315 = vector.multi_reduction <add>, %314, %cst_120 [1] : vector<16x4xf32> to vector<16xf32>
    %316 = vector.shape_cast %315 : vector<16xf32> to vector<16x1xf32>
    %317 = arith.addf %313, %316 : vector<16x1xf32>
    %cst_121 = arith.constant 1.1920929E-7 : f32
    %318 = vector.broadcast %cst_121 : f32 to vector<16x1xf32>
    %319 = arith.maximumf %317, %318 : vector<16x1xf32>
    %320 = arith.mulf %280, %294 : vector<16x4xf32>
    %321 = arith.mulf %280, %310 : vector<16x4xf32>
    %322 = arith.addf %320, %321 : vector<16x4xf32>
    %323 = vector.broadcast %319 : vector<16x1xf32> to vector<16x4xf32>
    %324 = arith.divf %322, %323 : vector<16x4xf32>
    %c0_122 = arith.constant 0 : index
    %c0_123 = arith.constant 0 : index
    %325 = vector.load %arg23[%c0_122, %c0_123] : memref<32x256xf32, #tpu.memory_space<vmem>>, vector<32x256xf32>
    %cst_124 = arith.constant dense<0.000000e+00> : vector<16x256xf32>
    %326 = tpu.matmul %269, %325, %cst_124 {dimension_numbers = #tpu.dot_dimension_numbers<[1], [0], [0], [1], [0, 0, 1, 1], [], []>} : vector<16x32xf32>, vector<32x256xf32>, vector<16x256xf32> -> vector<16x256xf32>
    %c0_125 = arith.constant 0 : index
    %c0_126 = arith.constant 0 : index
    %327 = vector.load %arg24[%c0_125, %c0_126] : memref<1x256xf32, #tpu.memory_space<vmem>>, vector<1x256xf32>
    %328 = vector.broadcast %327 : vector<1x256xf32> to vector<16x256xf32>
    %329 = arith.addf %326, %328 : vector<16x256xf32>
    %cst_127 = arith.constant 0.000000e+00 : f32
    %330 = vector.broadcast %cst_127 : f32 to vector<16x256xf32>
    %331 = arith.maximumf %329, %330 : vector<16x256xf32>
    %332 = vector.extract_strided_slice %324 {offsets = [0, 0], sizes = [16, 1], strides = [1, 1]} : vector<16x4xf32> to vector<16x1xf32>
    %333 = vector.extract_strided_slice %331 {offsets = [0, 0], sizes = [16, 64], strides = [1, 1]} : vector<16x256xf32> to vector<16x64xf32>
    %334 = vector.broadcast %332 : vector<16x1xf32> to vector<16x64xf32>
    %335 = arith.mulf %334, %333 : vector<16x64xf32>
    %336 = vector.extract_strided_slice %324 {offsets = [0, 1], sizes = [16, 1], strides = [1, 1]} : vector<16x4xf32> to vector<16x1xf32>
    %337 = vector.extract_strided_slice %331 {offsets = [0, 64], sizes = [16, 64], strides = [1, 1]} : vector<16x256xf32> to vector<16x64xf32>
    %338 = vector.broadcast %336 : vector<16x1xf32> to vector<16x64xf32>
    %339 = arith.mulf %338, %337 : vector<16x64xf32>
    %340 = vector.extract_strided_slice %324 {offsets = [0, 2], sizes = [16, 1], strides = [1, 1]} : vector<16x4xf32> to vector<16x1xf32>
    %341 = vector.extract_strided_slice %331 {offsets = [0, 128], sizes = [16, 64], strides = [1, 1]} : vector<16x256xf32> to vector<16x64xf32>
    %342 = vector.broadcast %340 : vector<16x1xf32> to vector<16x64xf32>
    %343 = arith.mulf %342, %341 : vector<16x64xf32>
    %344 = vector.extract_strided_slice %324 {offsets = [0, 3], sizes = [16, 1], strides = [1, 1]} : vector<16x4xf32> to vector<16x1xf32>
    %345 = vector.extract_strided_slice %331 {offsets = [0, 192], sizes = [16, 64], strides = [1, 1]} : vector<16x256xf32> to vector<16x64xf32>
    %346 = vector.broadcast %344 : vector<16x1xf32> to vector<16x64xf32>
    %347 = arith.mulf %346, %345 : vector<16x64xf32>
    %348 = tpu.concatenate %335, %339, %343, %347 in 1 : vector<16x64xf32>, vector<16x64xf32>, vector<16x64xf32>, vector<16x64xf32> -> vector<16x256xf32>
    %c0_128 = arith.constant 0 : index
    %c0_129 = arith.constant 0 : index
    %349 = vector.load %arg25[%c0_128, %c0_129] : memref<256x32xf32, #tpu.memory_space<vmem>>, vector<256x32xf32>
    %cst_130 = arith.constant dense<0.000000e+00> : vector<16x32xf32>
    %350 = tpu.matmul %348, %349, %cst_130 {dimension_numbers = #tpu.dot_dimension_numbers<[1], [0], [0], [1], [0, 0, 1, 1], [], []>} : vector<16x256xf32>, vector<256x32xf32>, vector<16x32xf32> -> vector<16x32xf32>
    %c0_131 = arith.constant 0 : index
    %c0_132 = arith.constant 0 : index
    %351 = vector.load %arg26[%c0_131, %c0_132] : memref<4x32xf32, #tpu.memory_space<vmem>>, vector<4x32xf32>
    %cst_133 = arith.constant dense<0.000000e+00> : vector<16x32xf32>
    %352 = tpu.matmul %324, %351, %cst_133 {dimension_numbers = #tpu.dot_dimension_numbers<[1], [0], [0], [1], [0, 0, 1, 1], [], []>} : vector<16x4xf32>, vector<4x32xf32>, vector<16x32xf32> -> vector<16x32xf32>
    %353 = arith.addf %350, %352 : vector<16x32xf32>
    %354 = arith.addf %269, %353 : vector<16x32xf32>
    %c0_134 = arith.constant 0 : index
    %c0_135 = arith.constant 0 : index
    %355 = vector.load %arg20[%c0_134, %c0_135] : memref<1x32xf32, #tpu.memory_space<vmem>>, vector<1x32xf32>
    %c0_136 = arith.constant 0 : index
    %c0_137 = arith.constant 0 : index
    %356 = vector.load %arg21[%c0_136, %c0_137] : memref<1x32xf32, #tpu.memory_space<vmem>>, vector<1x32xf32>
    %cst_138 = arith.constant dense<0.000000e+00> : vector<16xf32>
    %357 = vector.multi_reduction <add>, %354, %cst_138 [1] : vector<16x32xf32> to vector<16xf32>
    %358 = vector.shape_cast %357 : vector<16xf32> to vector<16x1xf32>
    %cst_139 = arith.constant 3.200000e+01 : f32
    %359 = vector.broadcast %cst_139 : f32 to vector<16x1xf32>
    %360 = arith.divf %358, %359 : vector<16x1xf32>
    %361 = vector.broadcast %360 : vector<16x1xf32> to vector<16x32xf32>
    %362 = arith.subf %354, %361 : vector<16x32xf32>
    %363 = arith.mulf %362, %362 : vector<16x32xf32>
    %cst_140 = arith.constant dense<0.000000e+00> : vector<16xf32>
    %364 = vector.multi_reduction <add>, %363, %cst_140 [1] : vector<16x32xf32> to vector<16xf32>
    %365 = vector.shape_cast %364 : vector<16xf32> to vector<16x1xf32>
    %cst_141 = arith.constant 3.200000e+01 : f32
    %366 = vector.broadcast %cst_141 : f32 to vector<16x1xf32>
    %367 = arith.divf %365, %366 : vector<16x1xf32>
    %cst_142 = arith.constant 9.99999974E-6 : f32
    %368 = vector.broadcast %cst_142 : f32 to vector<16x1xf32>
    %369 = arith.addf %367, %368 : vector<16x1xf32>
    %370 = math.rsqrt %369 : vector<16x1xf32>
    %371 = vector.broadcast %370 : vector<16x1xf32> to vector<16x32xf32>
    %372 = arith.mulf %362, %371 : vector<16x32xf32>
    %373 = vector.broadcast %355 : vector<1x32xf32> to vector<16x32xf32>
    %374 = arith.mulf %372, %373 : vector<16x32xf32>
    %375 = vector.broadcast %356 : vector<1x32xf32> to vector<16x32xf32>
    %376 = arith.addf %374, %375 : vector<16x32xf32>
    %c0_143 = arith.constant 0 : index
    %c0_144 = arith.constant 0 : index
    %377 = vector.load %arg27[%c0_143, %c0_144] : memref<32x64xf32, #tpu.memory_space<vmem>>, vector<32x64xf32>
    %cst_145 = arith.constant dense<0.000000e+00> : vector<16x64xf32>
    %378 = tpu.matmul %376, %377, %cst_145 {dimension_numbers = #tpu.dot_dimension_numbers<[1], [0], [0], [1], [0, 0, 1, 1], [], []>} : vector<16x32xf32>, vector<32x64xf32>, vector<16x64xf32> -> vector<16x64xf32>
    %c0_146 = arith.constant 0 : index
    %c0_147 = arith.constant 0 : index
    %379 = vector.load %arg28[%c0_146, %c0_147] : memref<1x64xf32, #tpu.memory_space<vmem>>, vector<1x64xf32>
    %380 = vector.broadcast %379 : vector<1x64xf32> to vector<16x64xf32>
    %381 = arith.addf %378, %380 : vector<16x64xf32>
    %cst_148 = arith.constant dense<0xFF800000> : vector<16xf32>
    %382 = vector.multi_reduction <maximumf>, %381, %cst_148 [1] : vector<16x64xf32> to vector<16xf32>
    %383 = vector.shape_cast %382 : vector<16xf32> to vector<16x1xf32>
    %384 = vector.broadcast %383 : vector<16x1xf32> to vector<16x64xf32>
    %385 = arith.subf %381, %384 : vector<16x64xf32>
    %386 = math.exp %385 : vector<16x64xf32>
    %cst_149 = arith.constant dense<0.000000e+00> : vector<16xf32>
    %387 = vector.multi_reduction <add>, %386, %cst_149 [1] : vector<16x64xf32> to vector<16xf32>
    %388 = vector.shape_cast %387 : vector<16xf32> to vector<16x1xf32>
    %389 = math.log %388 : vector<16x1xf32>
    %390 = arith.addf %389, %383 : vector<16x1xf32>
    %391 = tpu.iota {dimensions = array<i32: 1>} : vector<16x64xi32>
    %c0_150 = arith.constant 0 : index
    %c0_151 = arith.constant 0 : index
    %392 = vector.load %arg1[%c0_150, %c0_151] : memref<16x1xi32, #tpu.memory_space<vmem>>, vector<16x1xi32>
    %393 = vector.broadcast %392 : vector<16x1xi32> to vector<16x64xi32>
    %394 = arith.cmpi eq, %391, %393 : vector<16x64xi32>
    %cst_152 = arith.constant 0.000000e+00 : f32
    %395 = vector.broadcast %cst_152 : f32 to vector<16x64xf32>
    %396 = arith.select %394, %381, %395 : vector<16x64xi1>, vector<16x64xf32>
    %cst_153 = arith.constant dense<0.000000e+00> : vector<16xf32>
    %397 = vector.multi_reduction <add>, %396, %cst_153 [1] : vector<16x64xf32> to vector<16xf32>
    %398 = vector.shape_cast %397 : vector<16xf32> to vector<16x1xf32>
    %399 = arith.subf %390, %398 : vector<16x1xf32>
    %cst_154 = arith.constant dense<0.000000e+00> : vector<1xf32>
    %400 = vector.multi_reduction <add>, %399, %cst_154 [0] : vector<16x1xf32> to vector<1xf32>
    %401 = vector.shape_cast %400 : vector<1xf32> to vector<1x1xf32>
    %c0_155 = arith.constant 0 : index
    %c0_156 = arith.constant 0 : index
    %402 = vector.load %arg29[%c0_155, %c0_156] : memref<1x1xf32, #tpu.memory_space<vmem>>, vector<1x1xf32>
    tpu.vector_store %arg29[%c0_155, %c0_156], %401 {strides = array<i32>} : memref<1x1xf32, #tpu.memory_space<vmem>>, vector<1x1xf32>,
    return
  }
}

</mosaic_0001>

<bundles_post_ra>
// kernel: rmoe_forward.1
= control target key start
LH: loop header
LB: loop body
LE: loop exit
PB: predicated region body
PF: predicated region fallthrough
CT: control target
= control target key end

     0   :  { %s2007_s6 = smov 1   ;;  %s2008_s10 = smov 2   ;;  %s2576_s0 = inlined_call_operand.smem [shape: u32[30], index: -1, kind: input, shape index: {}] }
   0x1   :  { %s2057_s5 = sld [smem:[%s2576_s0]]   ;;  %s2009_s14 = smov 3  }
   0x2   :  { %s2062_s9 = sld [smem:[%s2576_s0 + %s2007_s6]]   ;;  %s2010_s18 = smov 4  }
   0x3   :  { %s2067_s13 = sld [smem:[%s2576_s0 + %s2008_s10]]   ;;  %s2011_s22 = smov 5  }
   0x4   :  { %s2072_s17 = sld [smem:[%s2576_s0 + %s2009_s14]]   ;;  %s2012_s26 = smov 6  }
   0x5   :  { %s2077_s21 = sld [smem:[%s2576_s0 + %s2010_s18]]   ;;  %s2013_s30 = smov 7  }
   0x6   :  { %s2082_s25 = sld [smem:[%s2576_s0 + %s2011_s22]]   ;;  %s2014_s4 = smov 8  }
   0x7   :  { %s2087_s29 = sld [smem:[%s2576_s0 + %s2012_s26]]   ;;  %s2015_s10 = smov 9  }
   0x8   :  { %2582 = sst [smem:[#allocation5_spill]] %s2062_s9  ;;  %s2016_s15 = smov 10  }
   0x9   :  { %s2092_s3 = sld [smem:[%s2576_s0 + %s2013_s30]]   ;;  %s2017_s20 = smov 11  }
   0xa   :  { %s2097_s8 = sld [smem:[%s2576_s0 + %s2014_s4]]   ;;  %s2018_s26 = smov 12  }
   0xb   :  { %s2102_s14 = sld [smem:[%s2576_s0 + %s2015_s10]]   ;;  %s2019_s1 = smov 13  }
   0xc   :  { %s2107_s19 = sld [smem:[%s2576_s0 + %s2016_s15]]   ;;  %s2020_s7 = smov 14  }
   0xd   :  { %s2112_s24 = sld [smem:[%s2576_s0 + %s2017_s20]]   ;;  %s2021_s15 = smov 15  }
   0xe   :  { %s2117_s30 = sld [smem:[%s2576_s0 + %s2018_s26]]   ;;  %s2022_s22 = smov 16  }
   0xf   :  { %s2122_s6 = sld [smem:[%s2576_s0 + %s2019_s1]]   ;;  %s2023_s28 = smov 17  }
  0x10   :  { %s2127_s12 = sld [smem:[%s2576_s0 + %s2020_s7]]   ;;  %s2024_s7 = smov 18  }
  0x11   :  { %s2132_s20 = sld [smem:[%s2576_s0 + %s2021_s15]]   ;;  %s2025_s15 = smov 19  }
  0x12   :  { %s2137_s27 = sld [smem:[%s2576_s0 + %s2022_s22]]   ;;  %s2026_s22 = smov 20  }
  0x13   :  { %s2142_s4 = sld [smem:[%s2576_s0 + %s2023_s28]]   ;;  %s2027_s28 = smov 21  }
  0x14   :  { %s2147_s9 = sld [smem:[%s2576_s0 + %s2024_s7]]   ;;  %s2028_s7 = smov 22  }
  0x17   :  { %2583 = sst [smem:[#allocation6_spill]] %s2132_s20 }
  0x18   :  { %2584 = sst [smem:[#allocation7_spill]] %s2137_s27 }
  0x19   :  { %2585 = sst [smem:[#allocation8_spill]] %s2142_s4 }
  0x1a   :  { %2586 = sst [smem:[#allocation9_spill]] %s2147_s9 }
  0x1b   :  { %s2152_s20 = sld [smem:[%s2576_s0 + %s2025_s15]]   ;;  %s2029_s15 = smov 23  }
  0x1c   :  { %s2157_s27 = sld [smem:[%s2576_s0 + %s2026_s22]]   ;;  %s2030_s22 = smov 24  }
  0x1d   :  { %s2162_s4 = sld [smem:[%s2576_s0 + %s2027_s28]]   ;;  %s2031_s28 = smov 25  }
  0x1e   :  { %s2167_s9 = sld [smem:[%s2576_s0 + %s2028_s7]]   ;;  %s2032_s7 = smov 26  }
  0x21   :  { %2587 = sst [smem:[#allocation10_spill]] %s2152_s20 }
  0x22   :  { %2588 = sst [smem:[#allocation11_spill]] %s2157_s27 }
  0x23   :  { %2589 = sst [smem:[#allocation12_spill]] %s2162_s4 }
  0x24   :  { %2590 = sst [smem:[#allocation13_spill]] %s2167_s9 }
  0x25   :  { %s2172_s20 = sld [smem:[%s2576_s0 + %s2029_s15]]   ;;  %s2033_s15 = smov 27  }
  0x26   :  { %s2177_s27 = sld [smem:[%s2576_s0 + %s2030_s22]]   ;;  %s2034_s22 = smov 28  }
  0x27   :  { %s2182_s4 = sld [smem:[%s2576_s0 + %s2031_s28]]   ;;  %s2035_s28 = smov 29  }
  0x28   :  { %s2187_s9 = sld [smem:[%s2576_s0 + %s2032_s7]]  }
  0x2b   :  { %2591 = sst [smem:[#allocation14_spill]] %s2172_s20 }
  0x2c   :  { %2592 = sst [smem:[#allocation15_spill]] %s2177_s27 }
  0x2d   :  { %2593 = sst [smem:[#allocation16_spill]] %s2182_s4 }
  0x2e   :  { %s2192_s20 = sld [smem:[%s2576_s0 + %s2033_s15]]  }
  0x2f   :  { %s2197_s27 = sld [smem:[%s2576_s0 + %s2034_s22]]  }
  0x30   :  { %s2202_s4 = sld [smem:[%s2576_s0 + %s2035_s28]]  }
  0x31   :  { %v128_v0 = vld [vmem:[%s2067_s13 + $0x18] sm:$0xff]  ;;  %v127_v1 = vld [vmem:[%s2067_s13 + $0x10] sm:$0xff]  ;;  %v126_v2 = vld [vmem:[%s2067_s13 + $0x8] sm:$0xff]  ;;  %vm138_vm0 = vcmask 261120  }
  0x32   :  { %157 = vmatpush.msra.mxu0 %v128_v0  ;;  %v125_v3 = vld [vmem:[%s2067_s13] sm:$0xff] }
  0x33   :  { %v2209_v4 = vld [vmem:[%s2057_s5] sm:$0xff] }
  0x34   :  { %158 = vmatpush.msra.mxu0 %v127_v1 }
  0x36   :  { %159 = vmatpush.msra.mxu0 %v126_v2 }
  0x38   :  { %160 = vmatpush.msra.mxu0 %v125_v3 }
  0x39   :  { %64 = vsyncpa [#allocation3], 0  ;;  %1795 = vmatmul.msk.f32.vlgmr.msra.gmra.mxu0 %vm138_vm0, %v2209_v4  ;;  %v1896_v5 = vld [vmem:[%s2072_s17] ss:$0 sm:$0xff]  ;;  %s2036_s0 = smov 80   ;;  %s2037_s7 = smov 96   ;;  %v168_v11 = vlaneseq }
  0x3a   :  { %s2038_s13 = smov 112   ;;  %v2218_v8 = vld [vmem:[%s2057_s5 + $0x8] sm:$0xff]  ;;  %vm175_vm1 = vcmask 130048   ;;  %vm203_vm3 = vcmask 64512   ;;  %s2039_s5 = smov 48  }
  0x3b   :  { %v169_v12 = vshrl.u32 %v168_v11, 7  ;;  %v2224_v13 = vand.u32 127, %v168_v11  ;;  %s2040_s17 = smov 64   ;;  %s2041_s10 = smov 16  }
  0x3c   :  { %s1757_s11 = sshll.u32 %s2202_s4, 4  ;;  %s1997_s18 = scalar_lea.hbm %s2202_s4, 1  ;;  %s1758_s11 = int_to_ptr.hbm [resolvable:$true] %s1757_s11 }
  0x3d   :  { %vm2227_vm2 = vcmp.le.s32.totalorder %v2224_v13, %v169_v12  ;;  %s1993_s15 = sshra.s32 %s1758_s11, 4  ;;  %s1994_s15 = int_to_ptr.hbm [resolvable:$true] %s1993_s15 }
  0x3e   :  { %s1995_s16 = scalar_lea.hbm %s1994_s15, 1  ;;  %p1998_p1 = scmp.lt.s32.totalorder %s1994_s15, %s2202_s4 }
  0x3f   :  { %p1996_p0 = scmp.ne.s32.totalorder %s1994_s15, %s1995_s16  ;;  %p1999_p2 = scmp.lt.s32.totalorder %s1997_s18, %s1995_s16 }
  0x41   :  { %1796 = vmatmul.msk.f32.gmra.mxu0 %vm138_vm0, %v2218_v8  ;;  %p2000_p3 = por %p1999_p2, %p1998_p1 }
  0x43   :  { %p2001_p4 = pnand %p2000_p3, %p1996_p0 }
  0xb6   :  { %v162_v6 = vpop.f32.mrf.mxu0 }
  0xb7   :  { %v163_v7 = vadd.f32 %v1896_v5, %v162_v6 }
  0xb9   :  { %256 = vrot.lane.b32.xlu2 %v163_v7, %s2036_s0  ;;  %173 = vrot.lane.b32.xlu0 %v163_v7, %s2037_s7 }
  0xbe   :  { %v165_v10 = vpop.f32.mrf.mxu0 }
  0xbf   :  { %v2235_v19 = vadd.f32 %v1896_v5, %v165_v10 }
  0xc1   :  { %254 = vrot.lane.b32.xlu2 %v163_v7, %s2038_s13 }
 0x113   :  { %v257_v37 = vpop.permute.xlu2 %256 }
 0x11b   :  { %v255_v41 = vpop.permute.xlu2 %254 }
 0x12b   :  { %v174_v9 = vpop.permute.xlu0 %173 }
 0x12c   :  { %1797 = vmatpush.xpose.msk.msrb.mxu0 %vm175_vm1, %v174_v9 }
 0x12f   :  { %1798 = vmatmul.msk.f32.vlgmr.msrb.gmra.mxu0 %vm175_vm1, %v163_v7 }
 0x1ac   :  { %v197_v14 = vpop.f32.mrf.mxu0 }
 0x1ad   :  { %v200_v16 = vmul.f32 0.25, %v197_v14 }
 0x1af   :  { %v202_v17 = vsel %vm2227_vm2, %v200_v16, -1e+30 }
 0x1b0   :  { %v204_v18 = vsel %vm203_vm3, %v202_v17, -inf }
 0x1b1   :  { %205 = vmax.xlane.f32.xlu0 %v204_v18 }
 0x1c5   :  { %308 = vrot.lane.b32.xlu0 %v163_v7, %s2039_s5 }
 0x1cd   :  { %418 = vrot.lane.b32.xlu0 %v2235_v19, %s2038_s13 }
 0x224   :  { %v206_v20 = vpop.xlane.xlu0 %205 }
 0x225   :  { %v207_v21 = vsub.f32 %v202_v17, %v206_v20 }
 0x227   :  { %v208_v22 = vmul.f32 1.442695, %v207_v21 }
 0x229   :  { %1911 = vpow2.f32 %v208_v22 }
 0x22f   :  { %v1912_v23 = vpop.eup %1911 }
 0x230   :  { %v210_v24 = vsel %vm203_vm3, %v1912_v23, 0.0 }
 0x231   :  { %211 = vadd.xlane.f32.xlu1 %v210_v24 }
 0x237   :  { %v309_v25 = vpop.permute.xlu0 %308 }
 0x238   :  { %329 = vmatpush.msra.mxu2 %v309_v25 }
 0x23f   :  { %v419_v51 = vpop.permute.xlu0 %418 }
 0x24a   :  { %228 = vrot.lane.b32.xlu1 %v163_v7, %s2040_s17 }
 0x252   :  { %340 = vrot.lane.b32.xlu1 %v2235_v19, %s2037_s7 }
 0x2a4   :  { %v212_v26 = vpop.xlane.xlu1 %211 }
 0x2a5   :  { %1913 = vrcp.f32 %v212_v26  ;;  %v224_v32 = vand.u32 2147483648, %v212_v26  ;;  %vm218_vm5 = vweird.f32 %v212_v26  ;;  %v222_v33 = vand.u32 2147483647, %v212_v26 }
 0x2a7   :  { %v225_v35 = vor.u32 1.1754944e-38, %v224_v32  ;;  %vm223_vm7 = vcmp.eq.f32.partialorder %v222_v33, 8.507059e+37 }
 0x2ab   :  { %v1914_v27 = vpop.eup %1913 }
 0x2ac   :  { %v214_v28 = vmul.f32 %v1914_v27, %v212_v26  ;;  %vm219_vm4 = vweird.f32 %v1914_v27 }
 0x2ad   :  { %vm220_vm6 = vmor %vm218_vm5, %vm219_vm4 }
 0x2ae   :  { %v215_v29 = vsub.f32 1.0, %v214_v28 }
 0x2b0   :  { %v216_v30 = vmul.f32 %v1914_v27, %v215_v29 }
 0x2b2   :  { %v217_v31 = vadd.f32 %v1914_v27, %v216_v30 }
 0x2b4   :  { %v221_v34 = vsel %vm220_vm6, %v1914_v27, %v217_v31 }
 0x2b5   :  { %v226_v36 = vsel %vm223_vm7, %v225_v35, %v221_v34  ;;  %v133_v34 = vld [vmem:[%s2077_s21 + $0x18] sm:$0xff]  ;;  %v132_v35 = vld [vmem:[%s2077_s21 + $0x10] sm:$0xff] }
 0x2b6   :  { %v227_v39 = vmul.f32 %v1912_v23, %v226_v36  ;;  %v131_v36 = vld [vmem:[%s2077_s21 + $0x8] sm:$0xff] }
 0x2bc   :  { %v229_v38 = vpop.permute.xlu1 %228 }
 0x2bd   :  { %249 = vmatpush.msra.mxu3 %v229_v38 }
 0x2be   :  { %1799 = vmatmul.msk.f32.vlgmr.msra.gmra.mxu3 %vm203_vm3, %v227_v39 }
 0x2bf   :  { %1800 = vmatpush.xpose.msk.msrb.mxu3 %vm175_vm1, %v257_v37  ;;  %v130_v37 = vld [vmem:[%s2077_s21] sm:$0xff]  ;;  %s2596_s21 = sld [smem:[#allocation6_spill]] }
 0x2c4   :  { %v341_v40 = vpop.permute.xlu1 %340 }
 0x2c5   :  { %1803 = vmatpush.xpose.msk.msra.mxu1 %vm175_vm1, %v341_v40 }
 0x2c6   :  { %1801 = vmatmul.msk.f32.vlgmr.msrb.gmra.mxu3 %vm175_vm1, %v255_v41 }
 0x2c8   :  { %1804 = vmatmul.msk.f32.vlgmr.msra.gmra.mxu1 %vm175_vm1, %v2235_v19 }
 0x341   :  { %v2249_v42 = vpop.f32.mrf.mxu3 }
 0x345   :  { %v363_v43 = vpop.f32.mrf.mxu1 }
 0x346   :  { %v366_v44 = vmul.f32 0.25, %v363_v43 }
 0x348   :  { %v367_v45 = vsel %vm2227_vm2, %v366_v44, -1e+30 }
 0x349   :  { %v279_v46 = vpop.f32.mrf.mxu3  ;;  %v368_v47 = vsel %vm203_vm3, %v367_v45, -inf }
 0x34a   :  { %v282_v48 = vmul.f32 0.25, %v279_v46  ;;  %369 = vmax.xlane.f32.xlu0 %v368_v47 }
 0x34c   :  { %v283_v49 = vsel %vm2227_vm2, %v282_v48, -1e+30 }
 0x34d   :  { %v284_v50 = vsel %vm203_vm3, %v283_v49, -inf }
 0x34e   :  { %285 = vmax.xlane.f32.xlu2 %v284_v50 }
 0x366   :  { %420 = vrot.lane.b32.xlu2 %v2235_v19, %s2036_s0 }
 0x3bd   :  { %v370_v52 = vpop.xlane.xlu0 %369 }
 0x3be   :  { %v371_v53 = vsub.f32 %v367_v45, %v370_v52 }
 0x3c0   :  { %v372_v54 = vmul.f32 1.442695, %v371_v53 }
 0x3c1   :  { %v286_v55 = vpop.xlane.xlu2 %285 }
 0x3c2   :  { %1915 = vpow2.f32 %v372_v54  ;;  %v287_v56 = vsub.f32 %v283_v49, %v286_v55 }
 0x3c4   :  { %v288_v57 = vmul.f32 1.442695, %v287_v56 }
 0x3c6   :  { %1917 = vpow2.f32 %v288_v57 }
 0x3c8   :  { %v1916_v58 = vpop.eup %1915 }
 0x3c9   :  { %v421_v59 = vpop.permute.xlu2 %420  ;;  %v374_v60 = vsel %vm203_vm3, %v1916_v58, 0.0 }
 0x3ca   :  { %1806 = vmatpush.xpose.msk.msrb.mxu2 %vm175_vm1, %v421_v59  ;;  %375 = vadd.xlane.f32.xlu2 %v374_v60 }
 0x3cc   :  { %v1918_v61 = vpop.eup %1917 }
 0x3cd   :  { %v290_v62 = vsel %vm203_vm3, %v1918_v61, 0.0 }
 0x3ce   :  { %291 = vadd.xlane.f32.xlu1 %v290_v62 }
 0x3e2   :  { %472 = vrot.lane.b32.xlu2 %v2235_v19, %s2039_s5 }
 0x3e7   :  { %392 = vrot.lane.b32.xlu1 %v2235_v19, %s2040_s17 }
 0x43d   :  { %v376_v63 = vpop.xlane.xlu2 %375 }
 0x43e   :  { %1919 = vrcp.f32 %v376_v63  ;;  %v388_v18 = vand.u32 2147483648, %v376_v63  ;;  %vm382_vm12 = vweird.f32 %v376_v63  ;;  %v386_v20 = vand.u32 2147483647, %v376_v63 }
 0x440   :  { %v389_v25 = vor.u32 1.1754944e-38, %v388_v18  ;;  %vm387_vm15 = vcmp.eq.f32.partialorder %v386_v20, 8.507059e+37  ;;  %v602_v18 = vld [vmem:[%s2107_s19 + $0x10] sm:$0xff]  ;;  %v600_v20 = vld [vmem:[%s2107_s19] sm:$0xff] }
 0x441   :  { %v292_v0 = vpop.xlane.xlu1 %291 }
 0x442   :  { %1921 = vrcp.f32 %v292_v0  ;;  %v304_v11 = vand.u32 2147483648, %v292_v0  ;;  %v302_v14 = vand.u32 2147483647, %v292_v0  ;;  %vm298_vm10 = vweird.f32 %v292_v0 }
 0x444   :  { %v1920_v1 = vpop.eup %1919  ;;  %v305_v19 = vor.u32 1.1754944e-38, %v304_v11  ;;  %vm303_vm13 = vcmp.eq.f32.partialorder %v302_v14, 8.507059e+37 }
 0x445   :  { %v378_v2 = vmul.f32 %v1920_v1, %v376_v63  ;;  %v473_v3 = vpop.permute.xlu2 %472  ;;  %vm383_vm9 = vweird.f32 %v1920_v1  ;;  %v2042_v63 = vmov 32.0  }
 0x446   :  { %493 = vmatpush.msrb.mxu1 %v473_v3  ;;  %vm384_vm14 = vmor %vm382_vm12, %vm383_vm9  ;;  %vm651_vm12 = vcmask 523264  }
 0x447   :  { %v379_v5 = vsub.f32 1.0, %v378_v2 }
 0x448   :  { %v1922_v6 = vpop.eup %1921 }
 0x449   :  { %v294_v7 = vmul.f32 %v1922_v6, %v292_v0  ;;  %v380_v9 = vmul.f32 %v1920_v1, %v379_v5  ;;  %vm299_vm8 = vweird.f32 %v1922_v6 }
 0x44a   :  { %vm300_vm11 = vmor %vm298_vm10, %vm299_vm8 }
 0x44b   :  { %v295_v10 = vsub.f32 1.0, %v294_v7  ;;  %v381_v16 = vadd.f32 %v1920_v1, %v380_v9 }
 0x44d   :  { %v296_v12 = vmul.f32 %v1922_v6, %v295_v10  ;;  %v385_v23 = vsel %vm384_vm14, %v1920_v1, %v381_v16 }
 0x44e   :  { %v390_v26 = vsel %vm387_vm15, %v389_v25, %v385_v23 }
 0x44f   :  { %v297_v17 = vadd.f32 %v1922_v6, %v296_v12  ;;  %v391_v28 = vmul.f32 %v1916_v58, %v390_v26  ;;  %v2283_v58 = vld [vmem:[%s2082_s25] ss:$0 sm:$0xff]  ;;  %s2597_s25 = sld [smem:[#allocation7_spill]] }
 0x451   :  { %v301_v21 = vsel %vm300_vm11, %v1922_v6, %v297_v17  ;;  %v603_v17 = vld [vmem:[%s2107_s19 + $0x18] sm:$0xff] }
 0x452   :  { %v306_v22 = vsel %vm303_vm13, %v305_v19, %v301_v21  ;;  %626 = vmatpush.msra.mxu0 %v603_v17  ;;  %v601_v19 = vld [vmem:[%s2107_s19 + $0x8] sm:$0xff]  ;;  %s2602_s19 = sld [smem:[#allocation10_spill]] }
 0x453   :  { %v307_v24 = vmul.f32 %v1918_v61, %v306_v22 }
 0x454   :  { %627 = vmatpush.msra.mxu0 %v602_v18 }
 0x455   :  { %1802 = vmatmul.msk.f32.vlgmr.msra.gmra.mxu2 %vm203_vm3, %v307_v24 }
 0x456   :  { %628 = vmatpush.msra.mxu0 %v601_v19 }
 0x458   :  { %629 = vmatpush.msra.mxu0 %v600_v20 }
 0x459   :  { %v393_v27 = vpop.permute.xlu1 %392 }
 0x45a   :  { %413 = vmatpush.msra.mxu3 %v393_v27 }
 0x45b   :  { %1805 = vmatmul.msk.f32.vlgmr.msra.gmra.mxu3 %vm203_vm3, %v391_v28 }
 0x45c   :  { %524 = vmatpush.msrb.mxu3 %v133_v34 }
 0x45d   :  { %1807 = vmatmul.msk.f32.vlgmr.msrb.gmra.mxu2 %vm175_vm1, %v419_v51 }
 0x45e   :  { %525 = vmatpush.msrb.mxu3 %v132_v35 }
 0x460   :  { %526 = vmatpush.msrb.mxu3 %v131_v36  ;;  %v646_v36 = vld [vmem:[%s2117_s30 + $0x38] sm:$0xff] }
 0x461   :  { %666 = vmatpush.msra.mxu2 %v646_v36 }
 0x462   :  { %527 = vmatpush.msrb.mxu3 %v130_v37  ;;  %v645_v37 = vld [vmem:[%s2117_s30 + $0x30] sm:$0xff] }
 0x463   :  { %667 = vmatpush.msra.mxu2 %v645_v37 }
 0x4d8   :  { %v331_v29 = vpop.f32.mrf.mxu2 }
 0x4de   :  { %v415_v57 = vpop.f32.mrf.mxu3 }
 0x4e0   :  { %v443_v30 = vpop.f32.mrf.mxu2 }
 0x4e1   :  { %v446_v31 = vmul.f32 0.25, %v443_v30  ;;  %v1898_v30 = vld [vmem:[%s2087_s29] ss:$0 sm:$0xff]  ;;  %s2598_s29 = sld [smem:[#allocation8_spill]] }
 0x4e3   :  { %v447_v32 = vsel %vm2227_vm2, %v446_v31, -1e+30 }
 0x4e4   :  { %v448_v33 = vsel %vm203_vm3, %v447_v32, -inf }
 0x4e5   :  { %449 = vmax.xlane.f32.xlu1 %v448_v33  ;;  %v1899_v33 = vld [vmem:[%s2092_s3] ss:$0 sm:$0xff]  ;;  %s2599_s3 = sld [smem:[#allocation13_spill]] }
 0x4fe   :  { %335 = vrot.lane.b32.xlu1 %v331_v29, %s2041_s10 }
 0x558   :  { %v450_v38 = vpop.xlane.xlu1 %449 }
 0x559   :  { %v451_v39 = vsub.f32 %v447_v32, %v450_v38  ;;  %v644_v38 = vld [vmem:[%s2117_s30 + $0x28] sm:$0xff] }
 0x55a   :  { %668 = vmatpush.msra.mxu2 %v644_v38  ;;  %v1903_v38 = vld [vmem:[%s2102_s14] ss:$0 sm:$0xff]  ;;  %s2601_s14 = sld [smem:[#allocation9_spill]] }
 0x55b   :  { %v452_v40 = vmul.f32 1.442695, %v451_v39  ;;  %v643_v39 = vld [vmem:[%s2117_s30 + $0x20] sm:$0xff] }
 0x55c   :  { %669 = vmatpush.msra.mxu2 %v643_v39 }
 0x55d   :  { %1923 = vpow2.f32 %v452_v40  ;;  %v642_v40 = vld [vmem:[%s2117_s30 + $0x18] sm:$0xff] }
 0x55e   :  { %670 = vmatpush.msra.mxu2 %v642_v40 }
 0x563   :  { %v1924_v41 = vpop.eup %1923 }
 0x564   :  { %v454_v43 = vsel %vm203_vm3, %v1924_v41, 0.0 }
 0x565   :  { %455 = vadd.xlane.f32.xlu0 %v454_v43 }
 0x570   :  { %v336_v44 = vpop.permute.xlu1 %335 }
 0x571   :  { %v338_v45 = vsel %vm175_vm1, %v2249_v42, %v336_v44  ;;  %v641_v44 = vld [vmem:[%s2117_s30 + $0x10] sm:$0xff] }
 0x572   :  { %1809 = vmatmul.msk.f32.vlgmr.msrb.gmra.mxu3 %vm138_vm0, %v338_v45  ;;  %671 = vmatpush.msra.mxu2 %v641_v44 }
 0x5d8   :  { %v456_v46 = vpop.xlane.xlu0 %455 }
 0x5d9   :  { %1925 = vrcp.f32 %v456_v46  ;;  %v468_v50 = vand.u32 2147483648, %v456_v46  ;;  %v466_v52 = vand.u32 2147483647, %v456_v46  ;;  %vm462_vm5 = vweird.f32 %v456_v46 }
 0x5da   :  { %1927 = vrcp.f32 %v2042_v63 }
 0x5db   :  { %v469_v54 = vor.u32 1.1754944e-38, %v468_v50  ;;  %vm467_vm7 = vcmp.eq.f32.partialorder %v466_v52, 8.507059e+37 }
 0x5df   :  { %v1926_v47 = vpop.eup %1925 }
 0x5e0   :  { %v458_v48 = vmul.f32 %v1926_v47, %v456_v46  ;;  %vm463_vm4 = vweird.f32 %v1926_v47  ;;  %v1928_v0 = vpop.eup %1927  ;;  %v640_v46 = vld [vmem:[%s2117_s30 + $0x8] sm:$0xff] }
 0x5e1   :  { %vm464_vm6 = vmor %vm462_vm5, %vm463_vm4  ;;  %v546_v1 = vmul.f32 32.0, %v1928_v0  ;;  %vm550_vm8 = vweird.f32 %v1928_v0  ;;  %672 = vmatpush.msra.mxu2 %v640_v46  ;;  %v1904_v46 = vld [vmem:[%s2596_s21] ss:$0 sm:$0xff] }
 0x5e2   :  { %v459_v49 = vsub.f32 1.0, %v458_v48  ;;  %v639_v48 = vld [vmem:[%s2117_s30] sm:$0xff]  ;;  %s2605_s30 = sld [smem:[#allocation5_spill]] }
 0x5e3   :  { %v547_v2 = vsub.f32 1.0, %v546_v1  ;;  %673 = vmatpush.msra.mxu2 %v639_v48 }
 0x5e4   :  { %v460_v51 = vmul.f32 %v1926_v47, %v459_v49  ;;  %v1900_v49 = vld [vmem:[%s2112_s24] ss:$0 sm:$0xff]  ;;  %s2603_s24 = sld [smem:[#allocation16_spill]] }
 0x5e5   :  { %v548_v3 = vmul.f32 %v1928_v0, %v547_v2 }
 0x5e6   :  { %v461_v53 = vadd.f32 %v1926_v47, %v460_v51 }
 0x5e7   :  { %v549_v5 = vadd.f32 %v1928_v0, %v548_v3 }
 0x5e8   :  { %v465_v55 = vsel %vm464_vm6, %v1926_v47, %v461_v53 }
 0x5e9   :  { %v470_v56 = vsel %vm467_vm7, %v469_v54, %v465_v55  ;;  %v2289_v7 = vsel %vm550_vm8, %v1928_v0, %v549_v5 }
 0x5ea   :  { %v471_v42 = vmul.f32 %v1924_v41, %v470_v56 }
 0x5ec   :  { %1808 = vmatmul.msk.f32.vlgmr.msrb.gmra.mxu1 %vm203_vm3, %v471_v42  ;;  %v2319_v42 = vld [vmem:[%s2122_s6] ss:$0 sm:$0xff]  ;;  %s2606_s6 = sld [smem:[#allocation11_spill]] }
 0x5f5   :  { %v529_v59 = vpop.f32.mrf.mxu3 }
 0x5f6   :  { %v530_v60 = vadd.f32 %v2283_v58, %v529_v59 }
 0x5f8   :  { %v535_v61 = vadd.f32 %v530_v60, %v2209_v4 }
 0x5fa   :  { %v539_v62 = vsel %vm138_vm0, %v535_v61, 0.0 }
 0x5fb   :  { %540 = vadd.xlane.f32.xlu1 %v539_v62 }
 0x669   :  { %v495_v6 = vpop.f32.mrf.mxu1 }
 0x66a   :  { %499 = vrot.lane.b32.xlu0 %v495_v6, %s2041_s10 }
 0x66e   :  { %v541_v4 = vpop.xlane.xlu1 %540 }
 0x66f   :  { %v552_v9 = vmul.f32 %v2289_v7, %v541_v4 }
 0x671   :  { %v554_v10 = vsub.f32 %v535_v61, %v552_v9 }
 0x673   :  { %v556_v11 = vmul.f32 %v554_v10, %v554_v10 }
 0x675   :  { %v558_v12 = vsel %vm138_vm0, %v556_v11, 0.0 }
 0x676   :  { %559 = vadd.xlane.f32.xlu2 %v558_v12 }
 0x6dc   :  { %v500_v14 = vpop.permute.xlu0 %499 }
 0x6dd   :  { %v502_v16 = vsel %vm175_vm1, %v415_v57, %v500_v14 }
 0x6de   :  { %1810 = vmatmul.msk.f32.gmra.mxu3 %vm138_vm0, %v502_v16 }
 0x6e9   :  { %v560_v21 = vpop.xlane.xlu2 %559 }
 0x6ea   :  { %v564_v22 = vmul.f32 %v560_v21, %v2289_v7 }
 0x6ec   :  { %v566_v23 = vadd.f32 1e-05, %v564_v22  ;;  %v742_v22 = vld [vmem:[%s2127_s12 + $0x18] sm:$0xff] }
 0x6ed   :  { %770 = vmatpush.msra.mxu1 %v742_v22 }
 0x6ee   :  { %1929 = vrsqrt.f32 %v566_v23  ;;  %vm574_vm10 = vweird.f32 %v566_v23 }
 0x6f4   :  { %v1930_v24 = vpop.eup %1929 }
 0x6f5   :  { %v569_v25 = vmul.f32 %v1930_v24, %v566_v23  ;;  %vm575_vm9 = vweird.f32 %v1930_v24  ;;  %v741_v23 = vld [vmem:[%s2127_s12 + $0x10] sm:$0xff] }
 0x6f6   :  { %vm576_vm11 = vmor %vm574_vm10, %vm575_vm9  ;;  %771 = vmatpush.msra.mxu1 %v741_v23 }
 0x6f7   :  { %v570_v26 = vmul.f32 %v1930_v24, %v569_v25  ;;  %v739_v25 = vld [vmem:[%s2127_s12] sm:$0xff] }
 0x6f9   :  { %v571_v27 = vmul.f32 0.5, %v570_v26 }
 0x6fb   :  { %v572_v28 = vsub.f32 1.5, %v571_v27 }
 0x6fd   :  { %v573_v29 = vmul.f32 %v1930_v24, %v572_v28 }
 0x6ff   :  { %v577_v31 = vsel %vm576_vm11, %v1930_v24, %v573_v29  ;;  %v740_v24 = vld [vmem:[%s2127_s12 + $0x8] sm:$0xff]  ;;  %s2607_s12 = sld [smem:[#allocation12_spill]] }
 0x700   :  { %v588_v32 = vmul.f32 %v577_v31, %v554_v10  ;;  %772 = vmatpush.msra.mxu1 %v740_v24 }
 0x702   :  { %v593_v34 = vmul.f32 %v1898_v30, %v588_v32  ;;  %773 = vmatpush.msra.mxu1 %v739_v25 }
 0x704   :  { %v598_v35 = vadd.f32 %v1899_v33, %v593_v34 }
 0x706   :  { %1811 = vmatmul.msk.f32.vlgmr.msra.gmra.mxu0 %vm138_vm0, %v598_v35 }
 0x761   :  { %v532_v41 = vpop.f32.mrf.mxu3 }
 0x762   :  { %v533_v43 = vadd.f32 %v2283_v58, %v532_v41 }
 0x764   :  { %v536_v45 = vadd.f32 %v533_v43, %v2218_v8 }
 0x766   :  { %v542_v47 = vsel %vm138_vm0, %v536_v45, 0.0 }
 0x767   :  { %543 = vadd.xlane.f32.xlu0 %v542_v47 }
 0x783   :  { %v631_v50 = vpop.f32.mrf.mxu0 }
 0x784   :  { %v632_v51 = vadd.f32 %v1900_v49, %v631_v50 }
 0x786   :  { %v637_v52 = vmax.f32 %v632_v51, 0.0 }
 0x788   :  { %1813 = vmatmul.msk.f32.vlgmr.msra.gmra.mxu2 %vm651_vm12, %v637_v52 }
 0x7da   :  { %v544_v53 = vpop.xlane.xlu0 %543 }
 0x7db   :  { %v553_v54 = vmul.f32 %v2289_v7, %v544_v53 }
 0x7dd   :  { %v555_v8 = vsub.f32 %v536_v45, %v553_v54 }
 0x7df   :  { %v557_v55 = vmul.f32 %v555_v8, %v555_v8 }
 0x7e1   :  { %v561_v56 = vsel %vm138_vm0, %v557_v55, 0.0 }
 0x7e2   :  { %562 = vadd.xlane.f32.xlu1 %v561_v56 }
 0x80b   :  { %v675_v57 = vpop.f32.mrf.mxu2 }
 0x80c   :  { %v676_v58 = vadd.f32 %v2319_v42, %v675_v57 }
 0x80e   :  { %v681_v59 = vadd.f32 %v676_v58, %v598_v35  ;;  %v1902_v35 = vld [vmem:[%s2097_s8] ss:$0 sm:$0xff]  ;;  %s2600_s8 = sld [smem:[#allocation14_spill]] }
 0x810   :  { %v685_v60 = vsel %vm138_vm0, %v681_v59, 0.0 }
 0x811   :  { %686 = vadd.xlane.f32.xlu1 %v685_v60 }
 0x855   :  { %v563_v61 = vpop.xlane.xlu1 %562 }
 0x856   :  { %v565_v62 = vmul.f32 %v563_v61, %v2289_v7 }
 0x858   :  { %v567_v63 = vadd.f32 1e-05, %v565_v62 }
 0x85a   :  { %1931 = vrsqrt.f32 %v567_v63  ;;  %vm584_vm14 = vweird.f32 %v567_v63 }
 0x860   :  { %v1932_v0 = vpop.eup %1931 }
 0x861   :  { %v579_v1 = vmul.f32 %v1932_v0, %v567_v63  ;;  %vm585_vm13 = vweird.f32 %v1932_v0 }
 0x862   :  { %vm586_vm15 = vmor %vm584_vm14, %vm585_vm13 }
 0x863   :  { %v580_v2 = vmul.f32 %v1932_v0, %v579_v1 }
 0x865   :  { %v581_v3 = vmul.f32 0.5, %v580_v2 }
 0x867   :  { %v582_v5 = vsub.f32 1.5, %v581_v3 }
 0x869   :  { %v583_v6 = vmul.f32 %v1932_v0, %v582_v5 }
 0x86b   :  { %v587_v4 = vsel %vm586_vm15, %v1932_v0, %v583_v6 }
 0x86c   :  { %v589_v9 = vmul.f32 %v587_v4, %v555_v8 }
 0x86e   :  { %v594_v10 = vmul.f32 %v1898_v30, %v589_v9 }
 0x870   :  { %v599_v11 = vadd.f32 %v1899_v33, %v594_v10 }
 0x872   :  { %1812 = vmatmul.msk.f32.gmra.mxu0 %vm138_vm0, %v599_v11 }
 0x884   :  { %v687_v12 = vpop.xlane.xlu1 %686 }
 0x885   :  { %v691_v14 = vmul.f32 %v687_v12, %v2289_v7 }
 0x887   :  { %v693_v16 = vsub.f32 %v681_v59, %v691_v14 }
 0x889   :  { %v695_v17 = vmul.f32 %v693_v16, %v693_v16 }
 0x88b   :  { %v697_v18 = vsel %vm138_vm0, %v695_v17, 0.0 }
 0x88c   :  { %698 = vadd.xlane.f32.xlu1 %v697_v18 }
 0x8ef   :  { %v634_v19 = vpop.f32.mrf.mxu0 }
 0x8f0   :  { %v635_v20 = vadd.f32 %v1900_v49, %v634_v19 }
 0x8f2   :  { %v638_v21 = vmax.f32 %v635_v20, 0.0 }
 0x8f4   :  { %1814 = vmatmul.msk.f32.gmra.mxu2 %vm651_vm12, %v638_v21 }
 0x8ff   :  { %v699_v26 = vpop.xlane.xlu1 %698 }
 0x900   :  { %v703_v27 = vmul.f32 %v699_v26, %v2289_v7 }
 0x902   :  { %v705_v28 = vadd.f32 1e-05, %v703_v27 }
 0x904   :  { %1933 = vrsqrt.f32 %v705_v28  ;;  %vm713_vm5 = vweird.f32 %v705_v28 }
 0x90a   :  { %v1934_v29 = vpop.eup %1933 }
 0x90b   :  { %v708_v30 = vmul.f32 %v1934_v29, %v705_v28  ;;  %vm714_vm4 = vweird.f32 %v1934_v29 }
 0x90c   :  { %vm715_vm6 = vmor %vm713_vm5, %vm714_vm4 }
 0x90d   :  { %v709_v31 = vmul.f32 %v1934_v29, %v708_v30 }
 0x90f   :  { %v710_v32 = vmul.f32 0.5, %v709_v31 }
 0x911   :  { %v711_v33 = vsub.f32 1.5, %v710_v32 }
 0x913   :  { %v712_v34 = vmul.f32 %v1934_v29, %v711_v33 }
 0x915   :  { %v716_v36 = vsel %vm715_vm6, %v1934_v29, %v712_v34 }
 0x916   :  { %v727_v37 = vmul.f32 %v716_v36, %v693_v16 }
 0x918   :  { %v732_v39 = vmul.f32 %v1902_v35, %v727_v37 }
 0x91a   :  { %v2335_v40 = vadd.f32 %v1903_v38, %v732_v39 }
 0x91c   :  { %1815 = vmatmul.msk.f32.vlgmr.msra.gmra.mxu1 %vm138_vm0, %v2335_v40 }
 0x977   :  { %v678_v41 = vpop.f32.mrf.mxu2 }
 0x978   :  { %v679_v43 = vadd.f32 %v2319_v42, %v678_v41 }
 0x97a   :  { %v682_v44 = vadd.f32 %v679_v43, %v599_v11 }
 0x97c   :  { %v688_v45 = vsel %vm138_vm0, %v682_v44, 0.0 }
 0x97d   :  { %689 = vadd.xlane.f32.xlu2 %v688_v45 }
 0x999   :  { %v775_v47 = vpop.f32.mrf.mxu1 }
 0x99a   :  { %v2342_v48 = vadd.f32 %v1904_v46, %v775_v47 }
 0x99c   :  { %782 = vrot.lane.b32.xlu0 %v2342_v48, %s2037_s7 }
 0x9f0   :  { %v690_v49 = vpop.xlane.xlu2 %689 }
 0x9f1   :  { %v692_v50 = vmul.f32 %v690_v49, %v2289_v7 }
 0x9f3   :  { %v694_v51 = vsub.f32 %v682_v44, %v692_v50 }
 0x9f5   :  { %v696_v52 = vmul.f32 %v694_v51, %v694_v51 }
 0x9f7   :  { %v700_v53 = vsel %vm138_vm0, %v696_v52, 0.0 }
 0x9f8   :  { %701 = vadd.xlane.f32.xlu1 %v700_v53 }
 0xa0e   :  { %v783_v54 = vpop.permute.xlu0 %782 }
 0xa0f   :  { %1817 = vmatpush.xpose.msk.msra.mxu3 %vm175_vm1, %v783_v54 }
 0xa11   :  { %862 = vrot.lane.b32.xlu1 %v2342_v48, %s2036_s0 }
 0xa12   :  { %1818 = vmatmul.msk.f32.vlgmr.msra.gmra.mxu3 %vm175_vm1, %v2342_v48 }
 0xa6b   :  { %v702_v8 = vpop.xlane.xlu1 %701 }
 0xa6c   :  { %v704_v55 = vmul.f32 %v702_v8, %v2289_v7 }
 0xa6e   :  { %v706_v56 = vadd.f32 1e-05, %v704_v55 }
 0xa70   :  { %1935 = vrsqrt.f32 %v706_v56  ;;  %vm723_vm8 = vweird.f32 %v706_v56 }
 0xa76   :  { %v1936_v42 = vpop.eup %1935 }
 0xa77   :  { %v718_v57 = vmul.f32 %v1936_v42, %v706_v56  ;;  %vm724_vm7 = vweird.f32 %v1936_v42 }
 0xa78   :  { %vm725_vm9 = vmor %vm723_vm8, %vm724_vm7 }
 0xa79   :  { %v719_v58 = vmul.f32 %v1936_v42, %v718_v57 }
 0xa7b   :  { %v720_v59 = vmul.f32 0.5, %v719_v58 }
 0xa7d   :  { %v721_v60 = vsub.f32 1.5, %v720_v59 }
 0xa7f   :  { %v722_v61 = vmul.f32 %v1936_v42, %v721_v60 }
 0xa81   :  { %v726_v62 = vsel %vm725_vm9, %v1936_v42, %v722_v61 }
 0xa82   :  { %v728_v63 = vmul.f32 %v726_v62, %v694_v51 }
 0xa83   :  { %v863_v0 = vpop.permute.xlu1 %862 }
 0xa84   :  { %1820 = vmatpush.xpose.msk.msrb.mxu1 %vm175_vm1, %v863_v0  ;;  %v733_v1 = vmul.f32 %v1902_v35, %v728_v63 }
 0xa86   :  { %v2355_v2 = vadd.f32 %v1903_v38, %v733_v1 }
 0xa88   :  { %1816 = vmatmul.msk.f32.gmra.mxu1 %vm138_vm0, %v2355_v2 }
 0xa95   :  { %v805_v3 = vpop.f32.mrf.mxu3 }
 0xa96   :  { %v808_v5 = vmul.f32 0.25, %v805_v3 }
 0xa98   :  { %v809_v6 = vsel %vm2227_vm2, %v808_v5, -1e+30 }
 0xa99   :  { %v810_v4 = vsel %vm203_vm3, %v809_v6, -inf }
 0xa9a   :  { %811 = vmax.xlane.f32.xlu2 %v810_v4 }
 0xab2   :  { %860 = vrot.lane.b32.xlu2 %v2342_v48, %s2038_s13 }
 0xb05   :  { %v778_v9 = vpop.f32.mrf.mxu1 }
 0xb06   :  { %v2364_v10 = vadd.f32 %v1904_v46, %v778_v9 }
 0xb08   :  { %946 = vrot.lane.b32.xlu2 %v2364_v10, %s2037_s7  ;;  %1026 = vrot.lane.b32.xlu0 %v2364_v10, %s2036_s0 }
 0xb0d   :  { %v812_v11 = vpop.xlane.xlu2 %811 }
 0xb0e   :  { %v813_v12 = vsub.f32 %v809_v6, %v812_v11 }
 0xb10   :  { %v814_v14 = vmul.f32 1.442695, %v813_v12  ;;  %1024 = vrot.lane.b32.xlu0 %v2364_v10, %s2038_s13 }
 0xb12   :  { %1937 = vpow2.f32 %v814_v14 }
 0xb15   :  { %v861_v16 = vpop.permute.xlu2 %860 }
 0xb16   :  { %1821 = vmatmul.msk.f32.vlgmr.msrb.gmra.mxu1 %vm175_vm1, %v861_v16 }
 0xb18   :  { %v1938_v17 = vpop.eup %1937  ;;  %834 = vrot.lane.b32.xlu0 %v2342_v48, %s2040_s17 }
 0xb19   :  { %v816_v18 = vsel %vm203_vm3, %v1938_v17, 0.0 }
 0xb1a   :  { %817 = vadd.xlane.f32.xlu1 %v816_v18 }
 0xb62   :  { %v947_v22 = vpop.permute.xlu2 %946 }
 0xb7a   :  { %v1027_v19 = vpop.permute.xlu0 %1026 }
 0xb7b   :  { %1826 = vmatpush.xpose.msk.msra.mxu1 %vm175_vm1, %v1027_v19 }
 0xb82   :  { %v1025_v20 = vpop.permute.xlu0 %1024 }
 0xb83   :  { %1827 = vmatmul.msk.f32.vlgmr.msra.gmra.mxu1 %vm175_vm1, %v1025_v20 }
 0xb8a   :  { %v835_v21 = vpop.permute.xlu0 %834 }
 0xb8b   :  { %855 = vmatpush.msrb.mxu0 %v835_v21 }
 0xb8d   :  { %1823 = vmatpush.xpose.msk.msra.mxu0 %vm175_vm1, %v947_v22  ;;  %v818_v23 = vpop.xlane.xlu1 %817 }
 0xb8e   :  { %1939 = vrcp.f32 %v818_v23  ;;  %v830_v31 = vand.u32 2147483648, %v818_v23  ;;  %v828_v33 = vand.u32 2147483647, %v818_v23  ;;  %vm824_vm11 = vweird.f32 %v818_v23 }
 0xb90   :  { %v831_v35 = vor.u32 1.1754944e-38, %v830_v31  ;;  %vm829_vm14 = vcmp.eq.f32.partialorder %v828_v33, 8.507059e+37  ;;  %v745_v31 = vld [vmem:[%s2597_s25 + $0x8] sm:$0xff] }
 0xb93   :  { %v885_v24 = vpop.f32.mrf.mxu1 }
 0xb94   :  { %v1940_v25 = vpop.eup %1939  ;;  %v888_v26 = vmul.f32 0.25, %v885_v24 }
 0xb95   :  { %v820_v27 = vmul.f32 %v1940_v25, %v818_v23  ;;  %vm825_vm10 = vweird.f32 %v1940_v25 }
 0xb96   :  { %v889_v28 = vsel %vm2227_vm2, %v888_v26, -1e+30  ;;  %vm826_vm13 = vmor %vm824_vm11, %vm825_vm10 }
 0xb97   :  { %v821_v29 = vsub.f32 1.0, %v820_v27  ;;  %v890_v30 = vsel %vm203_vm3, %v889_v28, -inf }
 0xb98   :  { %891 = vmax.xlane.f32.xlu0 %v890_v30  ;;  %v746_v30 = vld [vmem:[%s2597_s25 + $0x10] sm:$0xff] }
 0xb99   :  { %v822_v32 = vmul.f32 %v1940_v25, %v821_v29  ;;  %v747_v29 = vld [vmem:[%s2597_s25 + $0x18] sm:$0xff] }
 0xb9b   :  { %v823_v34 = vadd.f32 %v1940_v25, %v822_v32 }
 0xb9d   :  { %v827_v36 = vsel %vm826_vm13, %v1940_v25, %v823_v34 }
 0xb9e   :  { %v832_v37 = vsel %vm829_vm14, %v831_v35, %v827_v36 }
 0xb9f   :  { %v833_v38 = vmul.f32 %v1938_v17, %v832_v37 }
 0xba1   :  { %1819 = vmatmul.msk.f32.vlgmr.msrb.gmra.mxu0 %vm203_vm3, %v833_v38 }
 0xba2   :  { %1130 = vmatpush.msrb.mxu0 %v747_v29 }
 0xba4   :  { %1131 = vmatpush.msrb.mxu0 %v746_v30 }
 0xba6   :  { %1132 = vmatpush.msrb.mxu0 %v745_v31  ;;  %v1906_v31 = vld [vmem:[%s2601_s14] ss:$0 sm:$0xff] }
 0xba9   :  { %1824 = vmatmul.msk.f32.vlgmr.msra.gmra.mxu0 %vm175_vm1, %v2364_v10 }
 0xc00   :  { %v1049_v39 = vpop.f32.mrf.mxu1 }
 0xc01   :  { %v1052_v41 = vmul.f32 0.25, %v1049_v39 }
 0xc03   :  { %v1053_v43 = vsel %vm2227_vm2, %v1052_v41, -1e+30 }
 0xc04   :  { %v1054_v44 = vsel %vm203_vm3, %v1053_v43, -inf }
 0xc05   :  { %1055 = vmax.xlane.f32.xlu2 %v1054_v44 }
 0xc0b   :  { %v892_v45 = vpop.xlane.xlu0 %891 }
 0xc0c   :  { %v893_v46 = vsub.f32 %v889_v28, %v892_v45 }
 0xc0e   :  { %v894_v47 = vmul.f32 1.442695, %v893_v46 }
 0xc10   :  { %1941 = vpow2.f32 %v894_v47 }
 0xc16   :  { %v1942_v49 = vpop.eup %1941 }
 0xc17   :  { %v896_v50 = vsel %vm203_vm3, %v1942_v49, 0.0 }
 0xc18   :  { %897 = vadd.xlane.f32.xlu1 %v896_v50 }
 0xc1d   :  { %914 = vrot.lane.b32.xlu2 %v2342_v48, %s2039_s5 }
 0xc1e   :  { %v2391_v51 = vpop.f32.mrf.mxu0 }
 0xc26   :  { %v969_v52 = vpop.f32.mrf.mxu0 }
 0xc27   :  { %v972_v53 = vmul.f32 0.25, %v969_v52 }
 0xc29   :  { %v973_v54 = vsel %vm2227_vm2, %v972_v53, -1e+30 }
 0xc2a   :  { %v974_v8 = vsel %vm203_vm3, %v973_v54, -inf }
 0xc2b   :  { %975 = vmax.xlane.f32.xlu1 %v974_v8 }
 0xc44   :  { %1078 = vrot.lane.b32.xlu1 %v2364_v10, %s2039_s5 }
 0xc78   :  { %v1056_v55 = vpop.xlane.xlu2 %1055 }
 0xc79   :  { %v1057_v56 = vsub.f32 %v1053_v43, %v1056_v55 }
 0xc7b   :  { %v1058_v42 = vmul.f32 1.442695, %v1057_v56 }
 0xc7d   :  { %1943 = vpow2.f32 %v1058_v42 }
 0xc80   :  { %v915_v57 = vpop.permute.xlu2 %914 }
 0xc81   :  { %935 = vmatpush.msrb.mxu3 %v915_v57 }
 0xc83   :  { %v1944_v48 = vpop.eup %1943 }
 0xc84   :  { %v1060_v58 = vsel %vm203_vm3, %v1944_v48, 0.0 }
 0xc85   :  { %1061 = vadd.xlane.f32.xlu0 %v1060_v58 }
 0xc8b   :  { %v898_v59 = vpop.xlane.xlu1 %897 }
 0xc8c   :  { %1945 = vrcp.f32 %v898_v59  ;;  %v910_v62 = vand.u32 2147483648, %v898_v59  ;;  %v908_v0 = vand.u32 2147483647, %v898_v59  ;;  %vm904_vm15 = vweird.f32 %v898_v59 }
 0xc8e   :  { %v911_v3 = vor.u32 1.1754944e-38, %v910_v62  ;;  %vm909_vm5 = vcmp.eq.f32.partialorder %v908_v0, 8.507059e+37 }
 0xc92   :  { %v1946_v15 = vpop.eup %1945 }
 0xc93   :  { %v900_v60 = vmul.f32 %v1946_v15, %v898_v59  ;;  %vm905_vm2 = vweird.f32 %v1946_v15 }
 0xc94   :  { %vm906_vm4 = vmor %vm904_vm15, %vm905_vm2 }
 0xc95   :  { %v901_v61 = vsub.f32 1.0, %v900_v60 }
 0xc97   :  { %v902_v63 = vmul.f32 %v1946_v15, %v901_v61 }
 0xc99   :  { %v903_v1 = vadd.f32 %v1946_v15, %v902_v63 }
 0xc9b   :  { %v907_v5 = vsel %vm906_vm4, %v1946_v15, %v903_v1  ;;  %v1202_v1 = vld [vmem:[%s2599_s3 + $0x18] sm:$0xff] }
 0xc9c   :  { %v912_v6 = vsel %vm909_vm5, %v911_v3, %v907_v5  ;;  %v1388_v3 = vld [vmem:[%s2600_s8 + $0x30] sm:$0xff]  ;;  %v1389_v5 = vld [vmem:[%s2600_s8 + $0x38] sm:$0xff] }
 0xc9d   :  { %v913_v4 = vmul.f32 %v1942_v49, %v912_v6  ;;  %v744_v49 = vld [vmem:[%s2597_s25] sm:$0xff]  ;;  %1408 = vmatpush.msrb.mxu1 %v1388_v3  ;;  %v1201_v6 = vld [vmem:[%s2599_s3 + $0x10] sm:$0xff] }
 0xc9e   :  { %v976_v9 = vpop.xlane.xlu1 %975  ;;  %1133 = vmatpush.msrb.mxu0 %v744_v49 }
 0xc9f   :  { %v977_v11 = vsub.f32 %v973_v54, %v976_v9  ;;  %1822 = vmatmul.msk.f32.vlgmr.msrb.gmra.mxu3 %vm203_vm3, %v913_v4  ;;  %v1905_v54 = vld [vmem:[%s2598_s29] ss:$0 sm:$0xff]  ;;  %v1387_v9 = vld [vmem:[%s2600_s8 + $0x28] sm:$0xff] }
 0xca0   :  { %v1386_v4 = vld [vmem:[%s2600_s8 + $0x20] sm:$0xff] }
 0xca1   :  { %v978_v12 = vmul.f32 1.442695, %v977_v11  ;;  %1409 = vmatpush.msrb.mxu1 %v1386_v4  ;;  %v1200_v11 = vld [vmem:[%s2599_s3 + $0x8] sm:$0xff] }
 0xca3   :  { %1947 = vpow2.f32 %v978_v12  ;;  %v1385_v12 = vld [vmem:[%s2600_s8 + $0x18] sm:$0xff] }
 0xca9   :  { %v1948_v14 = vpop.eup %1947 }
 0xcaa   :  { %v980_v16 = vsel %vm203_vm3, %v1948_v14, 0.0 }
 0xcab   :  { %981 = vadd.xlane.f32.xlu0 %v980_v16  ;;  %v1382_v16 = vld [vmem:[%s2600_s8] sm:$0xff] }
 0xcb6   :  { %v1079_v17 = vpop.permute.xlu1 %1078 }
 0xcb7   :  { %1099 = vmatpush.msra.mxu3 %v1079_v17  ;;  %v1383_v17 = vld [vmem:[%s2600_s8 + $0x8] sm:$0xff] }
 0xcb9   :  { %1431 = vmatpush.msrb.mxu3 %v1389_v5 }
 0xcbb   :  { %1432 = vmatpush.msrb.mxu3 %v1387_v9 }
 0xcbd   :  { %1433 = vmatpush.msrb.mxu3 %v1385_v12 }
 0xcbf   :  { %998 = vrot.lane.b32.xlu0 %v2364_v10, %s2040_s17  ;;  %1434 = vmatpush.msrb.mxu3 %v1383_v17  ;;  %v2463_v17 = vcvt.s32.f32 %v2224_v13 }
 0xcf8   :  { %v1062_v18 = vpop.xlane.xlu0 %1061 }
 0xcf9   :  { %1949 = vrcp.f32 %v1062_v18  ;;  %v1074_v22 = vand.u32 2147483648, %v1062_v18  ;;  %v1072_v24 = vand.u32 2147483647, %v1062_v18  ;;  %vm1068_vm7 = vweird.f32 %v1062_v18 }
 0xcfb   :  { %v1075_v26 = vor.u32 1.1754944e-38, %v1074_v22  ;;  %vm1073_vm9 = vcmp.eq.f32.partialorder %v1072_v24, 8.507059e+37 }
 0xcff   :  { %v1950_v19 = vpop.eup %1949 }
 0xd00   :  { %v1064_v20 = vmul.f32 %v1950_v19, %v1062_v18  ;;  %vm1069_vm6 = vweird.f32 %v1950_v19 }
 0xd01   :  { %vm1070_vm8 = vmor %vm1068_vm7, %vm1069_vm6  ;;  %vm1232_vm6 = vcmask 31744  }
 0xd02   :  { %v1065_v21 = vsub.f32 1.0, %v1064_v20 }
 0xd04   :  { %v1066_v23 = vmul.f32 %v1950_v19, %v1065_v21 }
 0xd06   :  { %v1067_v25 = vadd.f32 %v1950_v19, %v1066_v23 }
 0xd08   :  { %v1071_v27 = vsel %vm1070_vm8, %v1950_v19, %v1067_v25 }
 0xd09   :  { %v1076_v28 = vsel %vm1073_vm9, %v1075_v26, %v1071_v27 }
 0xd0a   :  { %v1077_v10 = vmul.f32 %v1944_v48, %v1076_v28 }
 0xd0c   :  { %1828 = vmatmul.msk.f32.vlgmr.msra.gmra.mxu3 %vm203_vm3, %v1077_v10 }
 0xd1e   :  { %v982_v32 = vpop.xlane.xlu0 %981 }
 0xd1f   :  { %1951 = vrcp.f32 %v982_v32  ;;  %v994_v37 = vand.u32 2147483648, %v982_v32  ;;  %v992_v39 = vand.u32 2147483647, %v982_v32  ;;  %vm988_vm11 = vweird.f32 %v982_v32 }
 0xd21   :  { %v995_v43 = vor.u32 1.1754944e-38, %v994_v37  ;;  %vm993_vm14 = vcmp.eq.f32.partialorder %v992_v39, 8.507059e+37 }
 0xd22   :  { %v937_v33 = vpop.f32.mrf.mxu3 }
 0xd23   :  { %941 = vrot.lane.b32.xlu2 %v937_v33, %s2041_s10 }
 0xd25   :  { %v1952_v34 = vpop.eup %1951 }
 0xd26   :  { %v984_v35 = vmul.f32 %v1952_v34, %v982_v32  ;;  %vm989_vm10 = vweird.f32 %v1952_v34 }
 0xd27   :  { %vm990_vm13 = vmor %vm988_vm11, %vm989_vm10 }
 0xd28   :  { %v985_v36 = vsub.f32 1.0, %v984_v35 }
 0xd2a   :  { %v986_v38 = vmul.f32 %v1952_v34, %v985_v36 }
 0xd2c   :  { %v987_v41 = vadd.f32 %v1952_v34, %v986_v38 }
 0xd2e   :  { %v991_v44 = vsel %vm990_vm13, %v1952_v34, %v987_v41  ;;  %v1907_v34 = vld [vmem:[%s2602_s19] ss:$0 sm:$0xff] }
 0xd2f   :  { %v996_v45 = vsel %vm993_vm14, %v995_v43, %v991_v44 }
 0xd30   :  { %v997_v46 = vmul.f32 %v1948_v14, %v996_v45  ;;  %v1199_v14 = vld [vmem:[%s2599_s3] sm:$0xff] }
 0xd31   :  { %v999_v47 = vpop.permute.xlu0 %998 }
 0xd32   :  { %1019 = vmatpush.msrb.mxu2 %v999_v47 }
 0xd33   :  { %1825 = vmatmul.msk.f32.vlgmr.msrb.gmra.mxu2 %vm203_vm3, %v997_v46 }
 0xd34   :  { %1221 = vmatpush.msra.mxu2 %v1202_v1 }
 0xd36   :  { %1222 = vmatpush.msra.mxu2 %v1201_v6 }
 0xd38   :  { %1223 = vmatpush.msra.mxu2 %v1200_v11 }
 0xd3a   :  { %1224 = vmatpush.msra.mxu2 %v1199_v14 }
 0xd7d   :  { %v942_v50 = vpop.permute.xlu2 %941 }
 0xd7e   :  { %v944_v52 = vsel %vm175_vm1, %v2391_v51, %v942_v50 }
 0xd7f   :  { %1829 = vmatmul.msk.f32.vlgmr.msrb.gmra.mxu0 %vm138_vm0, %v944_v52 }
 0xd8f   :  { %v1101_v53 = vpop.f32.mrf.mxu3 }
 0xd90   :  { %1105 = vrot.lane.b32.xlu1 %v1101_v53, %s2041_s10 }
 0xdb6   :  { %v1021_v57 = vpop.f32.mrf.mxu2 }
 0xdfc   :  { %v1135_v8 = vpop.f32.mrf.mxu0 }
 0xdfd   :  { %v1136_v55 = vadd.f32 %v1905_v54, %v1135_v8 }
 0xdff   :  { %v1141_v56 = vadd.f32 %v1136_v55, %v2335_v40 }
 0xe01   :  { %v1145_v42 = vsel %vm138_vm0, %v1141_v56, 0.0 }
 0xe02   :  { %1146 = vadd.xlane.f32.xlu2 %v1145_v42  ;;  %v1106_v48 = vpop.permute.xlu1 %1105 }
 0xe03   :  { %v1108_v51 = vsel %vm175_vm1, %v1021_v57, %v1106_v48 }
 0xe04   :  { %1830 = vmatmul.msk.f32.gmra.mxu0 %vm138_vm0, %v1108_v51 }
 0xe75   :  { %v1147_v58 = vpop.xlane.xlu2 %1146 }
 0xe76   :  { %v1151_v59 = vmul.f32 %v1147_v58, %v2289_v7 }
 0xe78   :  { %v1153_v15 = vsub.f32 %v1141_v56, %v1151_v59 }
 0xe7a   :  { %v1155_v60 = vmul.f32 %v1153_v15, %v1153_v15 }
 0xe7c   :  { %v1157_v40 = vsel %vm138_vm0, %v1155_v60, 0.0 }
 0xe7d   :  { %1158 = vadd.xlane.f32.xlu1 %v1157_v40 }
 0xe81   :  { %v1138_v61 = vpop.f32.mrf.mxu0 }
 0xe82   :  { %v1139_v62 = vadd.f32 %v1905_v54, %v1138_v61 }
 0xe84   :  { %v1142_v63 = vadd.f32 %v1139_v62, %v2355_v2  ;;  %v1384_v2 = vld [vmem:[%s2600_s8 + $0x10] sm:$0xff] }
 0xe85   :  { %1410 = vmatpush.msrb.mxu1 %v1384_v2 }
 0xe86   :  { %v1148_v0 = vsel %vm138_vm0, %v1142_v63, 0.0 }
 0xe87   :  { %1149 = vadd.xlane.f32.xlu0 %v1148_v0  ;;  %1411 = vmatpush.msrb.mxu1 %v1382_v16 }
 0xef0   :  { %v1159_v18 = vpop.xlane.xlu1 %1158 }
 0xef1   :  { %v1163_v19 = vmul.f32 %v1159_v18, %v2289_v7 }
 0xef3   :  { %v1165_v20 = vadd.f32 1e-05, %v1163_v19 }
 0xef5   :  { %1953 = vrsqrt.f32 %v1165_v20  ;;  %vm1173_vm3 = vweird.f32 %v1165_v20 }
 0xefa   :  { %v1150_v21 = vpop.xlane.xlu0 %1149 }
 0xefb   :  { %v1954_v22 = vpop.eup %1953  ;;  %v1152_v23 = vmul.f32 %v1150_v21, %v2289_v7 }
 0xefc   :  { %v1168_v24 = vmul.f32 %v1954_v22, %v1165_v20  ;;  %vm1174_vm1 = vweird.f32 %v1954_v22 }
 0xefd   :  { %v1154_v25 = vsub.f32 %v1142_v63, %v1152_v23  ;;  %vm1175_vm2 = vmor %vm1173_vm3, %vm1174_vm1 }
 0xefe   :  { %v1169_v26 = vmul.f32 %v1954_v22, %v1168_v24 }
 0xeff   :  { %v1156_v27 = vmul.f32 %v1154_v25, %v1154_v25 }
 0xf00   :  { %v1170_v28 = vmul.f32 0.5, %v1169_v26 }
 0xf01   :  { %v1160_v10 = vsel %vm138_vm0, %v1156_v27, 0.0 }
 0xf02   :  { %v1171_v29 = vsub.f32 1.5, %v1170_v28  ;;  %1161 = vadd.xlane.f32.xlu2 %v1160_v10 }
 0xf04   :  { %v1172_v30 = vmul.f32 %v1954_v22, %v1171_v29 }
 0xf06   :  { %v1176_v32 = vsel %vm1175_vm2, %v1954_v22, %v1172_v30 }
 0xf07   :  { %v1187_v33 = vmul.f32 %v1176_v32, %v1153_v15 }
 0xf09   :  { %v1192_v35 = vmul.f32 %v1906_v31, %v1187_v33  ;;  %v2043_v33 = vmov 0.0  }
 0xf0b   :  { %v2440_v36 = vadd.f32 %v1907_v34, %v1192_v35 }
 0xf0d   :  { %1831 = vmatmul.msk.f32.vlgmr.msra.gmra.mxu2 %vm138_vm0, %v2440_v36  ;;  %1837 = vmatmul.msk.f32.vlgmr.msrb.gmra.mxu1 %vm138_vm0, %v2440_v36 }
 0xf0e   :  { %1839 = vmatmul.msk.f32.vlgmr.msrb.gmra.mxu3 %vm138_vm0, %v2440_v36 }
 0xf75   :  { %v1162_v37 = vpop.xlane.xlu2 %1161 }
 0xf76   :  { %v1164_v38 = vmul.f32 %v1162_v37, %v2289_v7 }
 0xf78   :  { %v1166_v39 = vadd.f32 1e-05, %v1164_v38 }
 0xf7a   :  { %1955 = vrsqrt.f32 %v1166_v39  ;;  %vm1183_vm4 = vweird.f32 %v1166_v39 }
 0xf80   :  { %v1956_v41 = vpop.eup %1955 }
 0xf81   :  { %v1178_v43 = vmul.f32 %v1956_v41, %v1166_v39  ;;  %vm1184_vm15 = vweird.f32 %v1956_v41 }
 0xf82   :  { %vm1185_vm5 = vmor %vm1183_vm4, %vm1184_vm15 }
 0xf83   :  { %v1179_v44 = vmul.f32 %v1956_v41, %v1178_v43 }
 0xf85   :  { %v1180_v45 = vmul.f32 0.5, %v1179_v44 }
 0xf87   :  { %v1181_v46 = vsub.f32 1.5, %v1180_v45 }
 0xf89   :  { %v1182_v47 = vmul.f32 %v1956_v41, %v1181_v46 }
 0xf8b   :  { %v1186_v49 = vsel %vm1185_vm5, %v1956_v41, %v1182_v47 }
 0xf8c   :  { %v1188_v50 = vmul.f32 %v1186_v49, %v1154_v25 }
 0xf8e   :  { %v1193_v52 = vmul.f32 %v1906_v31, %v1188_v50 }
 0xf90   :  { %v1226_v53 = vpop.f32.mrf.mxu2  ;;  %v2449_v54 = vadd.f32 %v1907_v34, %v1193_v52 }
 0xf91   :  { %v1233_v8 = vsel %vm1232_vm6, %v1226_v53, -inf }
 0xf92   :  { %1832 = vmatmul.msk.f32.gmra.mxu2 %vm138_vm0, %v2449_v54  ;;  %1838 = vmatmul.msk.f32.gmra.mxu1 %vm138_vm0, %v2449_v54 }
 0xf93   :  { %1840 = vmatmul.msk.f32.gmra.mxu3 %vm138_vm0, %v2449_v54  ;;  %1234 = vmax.xlane.f32.xlu0 %v1233_v8 }
0x1006   :  { %v1235_v55 = vpop.xlane.xlu0 %1234 }
0x1007   :  { %v1239_v56 = vsub.f32 %v1226_v53, %v1235_v55 }
0x1009   :  { %v1241_v42 = vmul.f32 1.442695, %v1239_v56 }
0x100b   :  { %1957 = vpow2.f32 %v1241_v42 }
0x1011   :  { %v1958_v57 = vpop.eup %1957 }
0x1012   :  { %v1245_v48 = vsel %vm1232_vm6, %v1958_v57, 0.0 }
0x1013   :  { %1246 = vadd.xlane.f32.xlu2 %v1245_v48 }
0x1015   :  { %v1229_v51 = vpop.f32.mrf.mxu2 }
0x1016   :  { %v1236_v58 = vsel %vm1232_vm6, %v1229_v51, -inf }
0x1017   :  { %1237 = vmax.xlane.f32.xlu1 %v1236_v58 }
0x1086   :  { %v1247_v59 = vpop.xlane.xlu2 %1246 }
0x1087   :  { %1959 = vrcp.f32 %v1247_v59  ;;  %v1262_v0 = vand.u32 2147483648, %v1247_v59  ;;  %v1260_v3 = vand.u32 2147483647, %v1247_v59  ;;  %vm1256_vm8 = vweird.f32 %v1247_v59 }
0x1089   :  { %v1263_v4 = vor.u32 1.1754944e-38, %v1262_v0  ;;  %vm1261_vm10 = vcmp.eq.f32.partialorder %v1260_v3, 8.507059e+37  ;;  %v1507_v0 = vld [vmem:[%s2603_s24 + $0x78] sm:$0xff] }
0x108a   :  { %v1238_v15 = vpop.xlane.xlu1 %1237  ;;  %1556 = vmatpush.msrb.mxu2 %v1507_v0 }
0x108b   :  { %v1240_v60 = vsub.f32 %v1229_v51, %v1238_v15  ;;  %v1524_v15 = vld [vmem:[%s2187_s9] sm:$0xf]  ;;  %s2604_s9 = sld [smem:[#allocation15_spill]] }
0x108d   :  { %v1960_v40 = vpop.eup %1959  ;;  %v1243_v61 = vmul.f32 1.442695, %v1240_v60  ;;  %v2044_v60 = vmov 1  }
0x108e   :  { %v1252_v62 = vmul.f32 %v1960_v40, %v1247_v59  ;;  %vm1257_vm7 = vweird.f32 %v1960_v40  ;;  %1889 = vset.pattern.permute.xlu2 %v2044_v60 }
0x108f   :  { %1961 = vpow2.f32 %v1243_v61  ;;  %vm1258_vm9 = vmor %vm1256_vm8, %vm1257_vm7 }
0x1090   :  { %v1253_v63 = vsub.f32 1.0, %v1252_v62 }
0x1092   :  { %v1254_v1 = vmul.f32 %v1960_v40, %v1253_v63 }
0x1094   :  { %v1255_v5 = vadd.f32 %v1960_v40, %v1254_v1  ;;  %v1506_v1 = vld [vmem:[%s2603_s24 + $0x70] sm:$0xff] }
0x1095   :  { %v1962_v6 = vpop.eup %1961  ;;  %1557 = vmatpush.msrb.mxu2 %v1506_v1 }
0x1096   :  { %v1259_v9 = vsel %vm1258_vm9, %v1960_v40, %v1255_v5  ;;  %v1248_v11 = vsel %vm1232_vm6, %v1962_v6, 0.0  ;;  %v2045_v40 = vmov 0  }
0x1097   :  { %v1264_v2 = vsel %vm1261_vm10, %v1263_v4, %v1259_v9  ;;  %1249 = vadd.xlane.f32.xlu0 %v1248_v11  ;;  %1888 = vset.pattern.permute.xlu1 %v2045_v40 }
0x1098   :  { %v1265_v12 = vmul.f32 %v1958_v57, %v1264_v2  ;;  %1890 = vset.pattern.permute.xlu0 %v2045_v40 }
0x109a   :  { %v1282_v14 = vsel %vm1232_vm6, %v1265_v12, -inf }
0x109b   :  { %1283 = vmax.xlane.f32.xlu1 %v1282_v14 }
0x110a   :  { %v1250_v16 = vpop.xlane.xlu0 %1249 }
0x110b   :  { %1963 = vrcp.f32 %v1250_v16  ;;  %v1277_v24 = vand.u32 2147483648, %v1250_v16  ;;  %v1275_v26 = vand.u32 2147483647, %v1250_v16  ;;  %vm1271_vm14 = vweird.f32 %v1250_v16 }
0x110d   :  { %v1278_v28 = vor.u32 1.1754944e-38, %v1277_v24  ;;  %vm1276_vm3 = vcmp.eq.f32.partialorder %v1275_v26, 8.507059e+37  ;;  %v2046_v24 = vmov 2   ;;  %v1505_v26 = vld [vmem:[%s2603_s24 + $0x68] sm:$0xff] }
0x110e   :  { %v1284_v18 = vpop.xlane.xlu1 %1283  ;;  %1558 = vmatpush.msrb.mxu2 %v1505_v26 }
0x110f   :  { %vm1288_vm11 = vcmp.ge.f32.partialorder %v1265_v12, %v1284_v18 }
0x1110   :  { %v1290_v19 = vsel %vm1288_vm11, %v2463_v17, 4.0  ;;  %vm1529_vm11 = vcmask 1043456  }
0x1111   :  { %v1964_v20 = vpop.eup %1963  ;;  %v1292_v21 = vsel %vm1232_vm6, %v1290_v19, inf  ;;  %1841 = vmatpush.msk.msra.mxu0 %vm1529_vm11, %v1524_v15 }
0x1112   :  { %v1267_v22 = vmul.f32 %v1964_v20, %v1250_v16  ;;  %1293 = vmin.xlane.f32.xlu0 %v1292_v21  ;;  %vm1272_vm13 = vweird.f32 %v1964_v20 }
0x1113   :  { %vm1273_vm1 = vmor %vm1271_vm14, %vm1272_vm13 }
0x1114   :  { %v1268_v23 = vsub.f32 1.0, %v1267_v22 }
0x1116   :  { %v1269_v25 = vmul.f32 %v1964_v20, %v1268_v23 }
0x1118   :  { %v1270_v27 = vadd.f32 %v1964_v20, %v1269_v25  ;;  %v2047_v25 = vmov 3  }
0x111a   :  { %v1274_v10 = vsel %vm1273_vm1, %v1964_v20, %v1270_v27  ;;  %v1504_v27 = vld [vmem:[%s2603_s24 + $0x60] sm:$0xff] }
0x111b   :  { %v1279_v29 = vsel %vm1276_vm3, %v1278_v28, %v1274_v10  ;;  %v1523_v28 = vld [vmem:[%s2603_s24 + $0xf8] sm:$0xff]  ;;  %v1522_v10 = vld [vmem:[%s2603_s24 + $0xf0] sm:$0xff]  ;;  %1559 = vmatpush.msrb.mxu2 %v1504_v27 }
0x111c   :  { %v2467_v30 = vmul.f32 %v1962_v6, %v1279_v29  ;;  %v1503_v29 = vld [vmem:[%s2603_s24 + $0x58] sm:$0xff]  ;;  %1579 = vmatpush.msra.mxu1 %v1523_v28 }
0x111d   :  { %1560 = vmatpush.msrb.mxu2 %v1503_v29 }
0x111e   :  { %v1285_v31 = vsel %vm1232_vm6, %v2467_v30, -inf  ;;  %1580 = vmatpush.msra.mxu1 %v1522_v10 }
0x111f   :  { %1286 = vmax.xlane.f32.xlu2 %v1285_v31  ;;  %v1501_v31 = vld [vmem:[%s2603_s24 + $0x48] sm:$0xff] }
0x1185   :  { %v1294_v32 = vpop.xlane.xlu0 %1293 }
0x1186   :  { %vm1298_vm2 = vcmp.eq.f32.partialorder %v2463_v17, %v1294_v32  ;;  %v1521_v32 = vld [vmem:[%s2603_s24 + $0xe8] sm:$0xff] }
0x1187   :  { %v1833_v34 = vsel %vm1298_vm2, 1.0, %v2043_v33  ;;  %1581 = vmatpush.msra.mxu1 %v1521_v32 }
0x1188   :  { %vm1304_vm15 = vcmp.gt.f32.partialorder %v1833_v34, 0.0  ;;  %v1330_v52 = vmul.f32 %v1833_v34, %v1265_v12  ;;  %v1520_v34 = vld [vmem:[%s2603_s24 + $0xe0] sm:$0xff] }
0x1189   :  { %v1306_v35 = vsel %vm1304_vm15, -1e+30, %v1265_v12  ;;  %1582 = vmatpush.msra.mxu1 %v1520_v34 }
0x118a   :  { %v1308_v37 = vsel %vm1232_vm6, %v1306_v35, -inf  ;;  %v1332_v53 = vsel %vm1232_vm6, %v1330_v52, 0.0 }
0x118b   :  { %1309 = vmax.xlane.f32.xlu2 %v1308_v37  ;;  %v1519_v37 = vld [vmem:[%s2603_s24 + $0xd8] sm:$0xff] }
0x118c   :  { %1583 = vmatpush.msra.mxu1 %v1519_v37 }
0x1192   :  { %v1287_v38 = vpop.xlane.xlu2 %1286 }
0x1193   :  { %vm1289_vm4 = vcmp.ge.f32.partialorder %v2467_v30, %v1287_v38  ;;  %v1498_v38 = vld [vmem:[%s2603_s24 + $0x30] sm:$0xff] }
0x1194   :  { %v1291_v39 = vsel %vm1289_vm4, %v2463_v17, 4.0 }
0x1195   :  { %v1295_v41 = vsel %vm1232_vm6, %v1291_v39, inf  ;;  %v1518_v39 = vld [vmem:[%s2603_s24 + $0xd0] sm:$0xff] }
0x1196   :  { %1296 = vmin.xlane.f32.xlu1 %v1295_v41  ;;  %v1497_v41 = vld [vmem:[%s2603_s24 + $0x28] sm:$0xff]  ;;  %1584 = vmatpush.msra.mxu1 %v1518_v39 }
0x11fe   :  { %v1310_v43 = vpop.xlane.xlu2 %1309 }
0x11ff   :  { %vm1314_vm5 = vcmp.ge.f32.partialorder %v1306_v35, %v1310_v43  ;;  %v1499_v35 = vld [vmem:[%s2603_s24 + $0x38] sm:$0xff]  ;;  %v1517_v43 = vld [vmem:[%s2603_s24 + $0xc8] sm:$0xff] }
0x1200   :  { %v1316_v44 = vsel %vm1314_vm5, %v2463_v17, 4.0  ;;  %1585 = vmatpush.msra.mxu1 %v1517_v43 }
0x1201   :  { %v1318_v45 = vsel %vm1232_vm6, %v1316_v44, inf  ;;  %v1496_v44 = vld [vmem:[%s2603_s24 + $0x20] sm:$0xff] }
0x1202   :  { %1319 = vmin.xlane.f32.xlu1 %v1318_v45  ;;  %v1516_v45 = vld [vmem:[%s2603_s24 + $0xc0] sm:$0xff] }
0x1203   :  { %1586 = vmatpush.msra.mxu1 %v1516_v45 }
0x1209   :  { %v1297_v46 = vpop.xlane.xlu1 %1296 }
0x120a   :  { %vm1299_vm7 = vcmp.eq.f32.partialorder %v2463_v17, %v1297_v46  ;;  %v1495_v46 = vld [vmem:[%s2603_s24 + $0x18] sm:$0xff] }
0x120b   :  { %v1834_v47 = vsel %vm1299_vm7, 1.0, %v2043_v33 }
0x120c   :  { %vm1305_vm8 = vcmp.gt.f32.partialorder %v1834_v47, 0.0  ;;  %v2487_v58 = vmul.f32 %v1834_v47, %v2467_v30  ;;  %v1515_v47 = vld [vmem:[%s2603_s24 + $0xb8] sm:$0xff] }
0x120d   :  { %v1307_v49 = vsel %vm1305_vm8, -1e+30, %v2467_v30  ;;  %1587 = vmatpush.msra.mxu1 %v1515_v47 }
0x120e   :  { %v1311_v50 = vsel %vm1232_vm6, %v1307_v49, -inf  ;;  %v1335_v59 = vsel %vm1232_vm6, %v2487_v58, 0.0 }
0x120f   :  { %1312 = vmax.xlane.f32.xlu0 %v1311_v50  ;;  %v1514_v50 = vld [vmem:[%s2603_s24 + $0xb0] sm:$0xff] }
0x1210   :  { %1588 = vmatpush.msra.mxu1 %v1514_v50 }
0x1217   :  { %1333 = vadd.xlane.f32.xlu0 %v1332_v53  ;;  %v1513_v53 = vld [vmem:[%s2603_s24 + $0xa8] sm:$0xff] }
0x1218   :  { %1589 = vmatpush.msra.mxu1 %v1513_v53 }
0x1275   :  { %v1320_v8 = vpop.xlane.xlu1 %1319 }
0x1276   :  { %vm1324_vm9 = vcmp.eq.f32.partialorder %v2463_v17, %v1320_v8  ;;  %v1492_v8 = vld [vmem:[%s2603_s24] sm:$0xff] }
0x1277   :  { %v1835_v55 = vsel %vm1324_vm9, 1.0, %v2043_v33 }
0x1278   :  { %v1338_v56 = vmul.f32 %v1835_v55, %v1265_v12  ;;  %v1512_v55 = vld [vmem:[%s2603_s24 + $0xa0] sm:$0xff] }
0x1279   :  { %1590 = vmatpush.msra.mxu1 %v1512_v55 }
0x127a   :  { %v1340_v42 = vsel %vm1232_vm6, %v1338_v56, 0.0  ;;  %v1350_v21 = vadd.f32 %v1338_v56, %v1330_v52  ;;  %v1493_v52 = vld [vmem:[%s2603_s24 + $0x8] sm:$0xff]  ;;  %v1511_v56 = vld [vmem:[%s2603_s24 + $0x98] sm:$0xff] }
0x127b   :  { %1341 = vadd.xlane.f32.xlu1 %v1340_v42  ;;  %1591 = vmatpush.msra.mxu1 %v1511_v56  ;;  %v1510_v42 = vld [vmem:[%s2603_s24 + $0x90] sm:$0xff] }
0x127d   :  { %1592 = vmatpush.msra.mxu1 %v1510_v42 }
0x1282   :  { %v1313_v57 = vpop.xlane.xlu0 %1312 }
0x1283   :  { %vm1315_vm10 = vcmp.ge.f32.partialorder %v1307_v49, %v1313_v57  ;;  %v1494_v49 = vld [vmem:[%s2603_s24 + $0x10] sm:$0xff]  ;;  %v1509_v57 = vld [vmem:[%s2603_s24 + $0x88] sm:$0xff] }
0x1284   :  { %v1317_v48 = vsel %vm1315_vm10, %v2463_v17, 4.0  ;;  %1593 = vmatpush.msra.mxu1 %v1509_v57 }
0x1285   :  { %v1321_v51 = vsel %vm1232_vm6, %v1317_v48, inf  ;;  %v1508_v48 = vld [vmem:[%s2603_s24 + $0x80] sm:$0xff] }
0x1286   :  { %1322 = vmin.xlane.f32.xlu2 %v1321_v51  ;;  %1594 = vmatpush.msra.mxu1 %v1508_v48  ;;  %v1390_v51 = vld [vmem:[%s2604_s9] sm:$0x3] }
0x1287   :  { %v1392_v15 = vperm.slane %v1390_v51, 0 }
0x128a   :  { %v1334_v61 = vpop.xlane.xlu0 %1333 }
0x128e   :  { %1336 = vadd.xlane.f32.xlu2 %v1335_v59 }
0x12ee   :  { %v1342_v62 = vpop.xlane.xlu1 %1341 }
0x12ef   :  { %v1346_v63 = vadd.f32 %v1342_v62, %v1334_v61 }
0x12f1   :  { %v1348_v3 = vmax.f32 %v1346_v63, 1.1920929e-07 }
0x12f3   :  { %1965 = vrcp.f32 %v1348_v3  ;;  %v1363_v12 = vand.u32 2147483648, %v1348_v3  ;;  %v1361_v16 = vand.u32 2147483647, %v1348_v3  ;;  %vm1357_vm1 = vweird.f32 %v1348_v3 }
0x12f5   :  { %v1364_v20 = vor.u32 1.1754944e-38, %v1363_v12  ;;  %vm1362_vm2 = vcmp.eq.f32.partialorder %v1361_v16, 8.507059e+37 }
0x12f9   :  { %v1966_v5 = vpop.eup %1965  ;;  %v1323_v6 = vpop.xlane.xlu2 %1322 }
0x12fa   :  { %v1353_v4 = vmul.f32 %v1966_v5, %v1348_v3  ;;  %vm1325_vm13 = vcmp.eq.f32.partialorder %v2463_v17, %v1323_v6  ;;  %vm1358_vm14 = vweird.f32 %v1966_v5  ;;  %v1436_v6 = vpop.f32.mrf.mxu3 }
0x12fb   :  { %v1836_v9 = vsel %vm1325_vm13, 1.0, %v2043_v33  ;;  %vm1359_vm3 = vmor %vm1357_vm1, %vm1358_vm14  ;;  %v1500_v33 = vld [vmem:[%s2603_s24 + $0x40] sm:$0xff] }
0x12fc   :  { %v1354_v11 = vsub.f32 1.0, %v1353_v4  ;;  %v2498_v2 = vmul.f32 %v1836_v9, %v2467_v30  ;;  %v1502_v30 = vld [vmem:[%s2603_s24 + $0x50] sm:$0xff] }
0x12fd   :  { %1561 = vmatpush.msrb.mxu2 %v1502_v30 }
0x12fe   :  { %v1355_v14 = vmul.f32 %v1966_v5, %v1354_v11  ;;  %v1343_v18 = vsel %vm1232_vm6, %v2498_v2, 0.0  ;;  %v1351_v30 = vadd.f32 %v2498_v2, %v2487_v58 }
0x12ff   :  { %1344 = vadd.xlane.f32.xlu0 %v1343_v18  ;;  %1562 = vmatpush.msrb.mxu2 %v1501_v31 }
0x1300   :  { %v1356_v19 = vadd.f32 %v1966_v5, %v1355_v14 }
0x1301   :  { %1563 = vmatpush.msrb.mxu2 %v1500_v33  ;;  %v1337_v59 = vpop.xlane.xlu2 %1336 }
0x1302   :  { %v1360_v17 = vsel %vm1359_vm3, %v1966_v5, %v1356_v19  ;;  %v1393_v5 = vperm.slane %v1390_v51, 1  ;;  %v1439_v2 = vpop.f32.mrf.mxu3 }
0x1303   :  { %v1365_v22 = vsel %vm1362_vm2, %v1364_v20, %v1360_v17  ;;  %1564 = vmatpush.msrb.mxu2 %v1499_v35 }
0x1304   :  { %v1366_v23 = vmul.f32 %v1365_v22, %v1350_v21  ;;  %v1437_v12 = vadd.f32 %v1436_v6, %v1393_v5  ;;  %v1440_v47 = vadd.f32 %v1439_v2, %v1393_v5  ;;  %v1662_v5 = vld [vmem:[%s2192_s20 + $0x10] sm:$0xff]  ;;  %v1661_v6 = vld [vmem:[%s2192_s20 + $0x8] sm:$0xff] }
0x1305   :  { %1565 = vmatpush.msrb.mxu2 %v1498_v38 }
0x1306   :  { %1459 = vperm.xlu2 %1889, %v1366_v23   ;;  %1448 = vperm.xlu1 %1888, %v1366_v23   ;;  %v1443_v20 = vmax.f32 %v1437_v12, 0.0 }
0x1307   :  { %1842 = vmatmul.msk.f32.vlgmr.msra.gmra.mxu0 %vm1232_vm6, %v1366_v23  ;;  %1566 = vmatpush.msrb.mxu2 %v1497_v41 }
0x1309   :  { %1567 = vmatpush.msrb.mxu2 %v1496_v44 }
0x130b   :  { %1568 = vmatpush.msrb.mxu2 %v1495_v46 }
0x130d   :  { %1569 = vmatpush.msrb.mxu2 %v1494_v49 }
0x130e   :  { %1891 = vset.pattern.permute.xlu2 %v2046_v24  ;;  %1892 = vset.pattern.permute.xlu1 %v2047_v25 }
0x130f   :  { %1469 = vperm.xlu2 %1891, %v1366_v23   ;;  %1479 = vperm.xlu1 %1892, %v1366_v23  }
0x1310   :  { %1570 = vmatpush.msrb.mxu2 %v1493_v52  ;;  %v1445_v52 = vmax.f32 %v1440_v47, 0.0 }
0x1312   :  { %1571 = vmatpush.msrb.mxu2 %v1492_v8 }
0x1317   :  { %1893 = vset.pattern.permute.xlu1 %v2044_v60  ;;  %v1413_v60 = vpop.f32.mrf.mxu1 }
0x1318   :  { %v1414_v62 = vadd.f32 %v1413_v60, %v1392_v15 }
0x131a   :  { %v1442_v3 = vmax.f32 %v1414_v62, 0.0 }
0x131f   :  { %v1416_v34 = vpop.f32.mrf.mxu1 }
0x1320   :  { %v1417_v35 = vadd.f32 %v1416_v34, %v1392_v15 }
0x1322   :  { %v1444_v37 = vmax.f32 %v1417_v35, 0.0 }
0x1360   :  { %v1460_v0 = vpop.permute.xlu2 %1459 }
0x1361   :  { %v1466_v9 = vmul.f32 %v1460_v0, %v1442_v3 }
0x1369   :  { %v1470_v18 = vpop.permute.xlu2 %1469 }
0x136a   :  { %v1476_v17 = vmul.f32 %v1470_v18, %v1443_v20 }
0x1372   :  { %v1345_v61 = vpop.xlane.xlu0 %1344 }
0x1373   :  { %v1347_v63 = vadd.f32 %v1345_v61, %v1337_v59 }
0x1375   :  { %v1349_v1 = vmax.f32 %v1347_v63, 1.1920929e-07 }
0x1377   :  { %1967 = vrcp.f32 %v1349_v1  ;;  %v1378_v22 = vand.u32 2147483648, %v1349_v1  ;;  %v1376_v26 = vand.u32 2147483647, %v1349_v1  ;;  %vm1372_vm4 = vweird.f32 %v1349_v1 }
0x1378   :  { %v1449_v4 = vpop.permute.xlu1 %1448 }
0x1379   :  { %v1456_v11 = vmul.f32 %v1449_v4, %v1442_v3  ;;  %v1379_v29 = vor.u32 1.1754944e-38, %v1378_v22  ;;  %vm1377_vm7 = vcmp.eq.f32.partialorder %v1376_v26, 8.507059e+37  ;;  %v1663_v3 = vld [vmem:[%s2192_s20 + $0x18] sm:$0xff]  ;;  %v1660_v4 = vld [vmem:[%s2192_s20] sm:$0xff]  ;;  %s2048_s20 = smov [#allocation2]  }
0x137a   :  { %1686 = vmatpush.msra.mxu3 %v1663_v3 }
0x137b   :  { %v1488_v14 = vsel %vm651_vm12, %v1456_v11, %v1466_v9  ;;  %v1721_v9 = vld [vmem:[%s2605_s30] sm:$0xff] }
0x137c   :  { %1572 = vmatmul.f32.vlgmr.msrb.gmra.mxu2 %v1488_v14  ;;  %1687 = vmatpush.msra.mxu3 %v1662_v5 }
0x137d   :  { %v1968_v16 = vpop.eup %1967 }
0x137e   :  { %v1368_v19 = vmul.f32 %v1968_v16, %v1349_v1  ;;  %vm1373_vm15 = vweird.f32 %v1968_v16  ;;  %1688 = vmatpush.msra.mxu3 %v1661_v6 }
0x137f   :  { %vm1374_vm5 = vmor %vm1372_vm4, %vm1373_vm15 }
0x1380   :  { %v1369_v21 = vsub.f32 1.0, %v1368_v19  ;;  %1689 = vmatpush.msra.mxu3 %v1660_v4 }
0x1381   :  { %v1480_v23 = vpop.permute.xlu1 %1479 }
0x1382   :  { %v1370_v24 = vmul.f32 %v1968_v16, %v1369_v21  ;;  %v1486_v27 = vmul.f32 %v1480_v23, %v1443_v20 }
0x1384   :  { %v1371_v28 = vadd.f32 %v1968_v16, %v1370_v24  ;;  %v1490_v10 = vsel %vm651_vm12, %v1476_v17, %v1486_v27  ;;  %v1550_v43 = vpop.f32.mrf.mxu0  ;;  %v1908_v27 = vld [vmem:[%s2606_s6] ss:$0 sm:$0xff] }
0x1385   :  { %1595 = vmatmul.f32.vlgmr.msra.gmra.mxu1 %v1490_v10 }
0x1386   :  { %v1375_v31 = vsel %vm1374_vm5, %v1968_v16, %v1371_v28 }
0x1387   :  { %v1380_v32 = vsel %vm1377_vm7, %v1379_v29, %v1375_v31  ;;  %v1909_v29 = vld [vmem:[%s2607_s12] ss:$0 sm:$0xff] }
0x1388   :  { %v1381_v33 = vmul.f32 %v1380_v32, %v1351_v30 }
0x138a   :  { %1453 = vperm.xlu0 %1890, %v1381_v33   ;;  %1473 = vperm.xlu2 %1891, %v1381_v33  }
0x138b   :  { %1463 = vperm.xlu1 %1893, %v1381_v33   ;;  %1843 = vmatmul.msk.f32.gmra.mxu0 %vm1232_vm6, %v1381_v33 }
0x1393   :  { %1894 = vset.pattern.permute.xlu1 %v2047_v25 }
0x1394   :  { %1483 = vperm.xlu1 %1894, %v1381_v33  }
0x139c   :  { %1895 = vset.pattern.permute.xlu1 %v2045_v40 }
0x13e4   :  { %v1474_v50 = vpop.permute.xlu2 %1473 }
0x13e5   :  { %v1477_v8 = vmul.f32 %v1474_v50, %v1445_v52 }
0x13fc   :  { %v1454_v38 = vpop.permute.xlu0 %1453 }
0x13fd   :  { %v1457_v39 = vmul.f32 %v1454_v38, %v1444_v37  ;;  %v1464_v58 = vpop.permute.xlu1 %1463 }
0x13fe   :  { %v1467_v41 = vmul.f32 %v1464_v58, %v1444_v37 }
0x13ff   :  { %v1573_v44 = vpop.f32.mrf.mxu2 }
0x1400   :  { %v1574_v45 = vadd.f32 %v1573_v44, %v1550_v43  ;;  %v1489_v46 = vsel %vm651_vm12, %v1457_v39, %v1467_v41  ;;  %v1910_v44 = vld [vmem:[%s2197_s27] ss:$0 sm:$0xff]  ;;  %s1755_s27 = sshll.u32 %s2048_s20, 4  ;;  %s1756_s27 = int_to_ptr.vmem [resolvable:$true] %s1755_s27 }
0x1401   :  { %1575 = vmatmul.f32.gmra.mxu2 %v1489_v46 }
0x1402   :  { %v1596_v49 = vpop.f32.mrf.mxu1 }
0x1403   :  { %v1597_v25 = vadd.f32 %v1596_v49, %v1574_v45 }
0x1405   :  { %v1602_v40 = vadd.f32 %v1597_v25, %v2440_v36  ;;  %v1722_v25 = vld [vmem:[%s2605_s30 + $0x8] sm:$0xff] }
0x1406   :  { %v1484_v53 = vpop.permute.xlu1 %1483 }
0x1407   :  { %v1487_v55 = vmul.f32 %v1484_v53, %v1445_v52  ;;  %v1606_v56 = vsel %vm138_vm0, %v1602_v40, 0.0 }
0x1408   :  { %1607 = vadd.xlane.f32.xlu2 %v1606_v56  ;;  %v1553_v15 = vpop.f32.mrf.mxu0 }
0x1409   :  { %v1491_v42 = vsel %vm651_vm12, %v1477_v8, %v1487_v55 }
0x140a   :  { %1598 = vmatmul.f32.gmra.mxu1 %v1491_v42 }
0x147b   :  { %v1608_v57 = vpop.xlane.xlu2 %1607 }
0x147c   :  { %v1612_v48 = vmul.f32 %v1608_v57, %v2289_v7 }
0x147e   :  { %v1614_v51 = vsub.f32 %v1602_v40, %v1612_v48 }
0x1480   :  { %v1616_v59 = vmul.f32 %v1614_v51, %v1614_v51 }
0x1482   :  { %v1618_v36 = vsel %vm138_vm0, %v1616_v59, 0.0 }
0x1483   :  { %1619 = vadd.xlane.f32.xlu1 %v1618_v36 }
0x1484   :  { %v1576_v60 = vpop.f32.mrf.mxu2 }
0x1485   :  { %v1577_v61 = vadd.f32 %v1576_v60, %v1553_v15 }
0x1487   :  { %v1599_v62 = vpop.f32.mrf.mxu1 }
0x1488   :  { %v1600_v63 = vadd.f32 %v1599_v62, %v1577_v61 }
0x148a   :  { %v1603_v0 = vadd.f32 %v1600_v63, %v2449_v54 }
0x148c   :  { %v1609_v1 = vsel %vm138_vm0, %v1603_v0, 0.0 }
0x148d   :  { %1610 = vadd.xlane.f32.xlu0 %v1609_v1 }
0x149c   :  { %1724 = vperm.xlu1 %1895, %v1721_v9  }
0x14f6   :  { %v1620_v11 = vpop.xlane.xlu1 %1619 }
0x14f7   :  { %v1624_v12 = vmul.f32 %v1620_v11, %v2289_v7 }
0x14f9   :  { %v1626_v14 = vadd.f32 1e-05, %v1624_v12 }
0x14fb   :  { %1969 = vrsqrt.f32 %v1626_v14  ;;  %vm1634_vm8 = vweird.f32 %v1626_v14 }
0x1500   :  { %v1611_v54 = vpop.xlane.xlu0 %1610 }
0x1501   :  { %v1970_v16 = vpop.eup %1969  ;;  %v1613_v18 = vmul.f32 %v1611_v54, %v2289_v7 }
0x1502   :  { %v1629_v19 = vmul.f32 %v1970_v16, %v1626_v14  ;;  %vm1635_vm6 = vweird.f32 %v1970_v16 }
0x1503   :  { %v1615_v20 = vsub.f32 %v1603_v0, %v1613_v18  ;;  %vm1636_vm9 = vmor %vm1634_vm8, %vm1635_vm6 }
0x1504   :  { %v1630_v21 = vmul.f32 %v1970_v16, %v1629_v19 }
0x1505   :  { %v1617_v17 = vmul.f32 %v1615_v20, %v1615_v20 }
0x1506   :  { %v1631_v22 = vmul.f32 0.5, %v1630_v21 }
0x1507   :  { %v1621_v23 = vsel %vm138_vm0, %v1617_v17, 0.0 }
0x1508   :  { %v1632_v24 = vsub.f32 1.5, %v1631_v22  ;;  %1622 = vadd.xlane.f32.xlu2 %v1621_v23 }
0x150a   :  { %v1633_v26 = vmul.f32 %v1970_v16, %v1632_v24 }
0x150c   :  { %v1637_v28 = vsel %vm1636_vm9, %v1970_v16, %v1633_v26 }
0x150d   :  { %v1648_v10 = vmul.f32 %v1637_v28, %v1614_v51 }
0x150e   :  { %v1725_v61 = vpop.permute.xlu1 %1724 }
0x150f   :  { %v1653_v30 = vmul.f32 %v1908_v27, %v1648_v10 }
0x1511   :  { %v1658_v31 = vadd.f32 %v1909_v29, %v1653_v30 }
0x1513   :  { %1844 = vmatmul.msk.f32.vlgmr.msra.gmra.mxu3 %vm138_vm0, %v1658_v31 }
0x157b   :  { %v1623_v32 = vpop.xlane.xlu2 %1622 }
0x157c   :  { %v1625_v33 = vmul.f32 %v1623_v32, %v2289_v7 }
0x157e   :  { %v1627_v34 = vadd.f32 1e-05, %v1625_v33 }
0x1580   :  { %1971 = vrsqrt.f32 %v1627_v34  ;;  %vm1644_vm11 = vweird.f32 %v1627_v34 }
0x1586   :  { %v1972_v35 = vpop.eup %1971 }
0x1587   :  { %v1639_v37 = vmul.f32 %v1972_v35, %v1627_v34  ;;  %vm1645_vm10 = vweird.f32 %v1972_v35 }
0x1588   :  { %vm1646_vm13 = vmor %vm1644_vm11, %vm1645_vm10 }
0x1589   :  { %v1640_v38 = vmul.f32 %v1972_v35, %v1639_v37 }
0x158b   :  { %v1641_v39 = vmul.f32 0.5, %v1640_v38 }
0x158d   :  { %v1642_v58 = vsub.f32 1.5, %v1641_v39 }
0x158f   :  { %v1643_v2 = vmul.f32 %v1972_v35, %v1642_v58 }
0x1591   :  { %v1647_v41 = vsel %vm1646_vm13, %v1972_v35, %v1643_v2 }
0x1592   :  { %v1649_v43 = vmul.f32 %v1647_v41, %v1615_v20 }
0x1594   :  { %v1654_v45 = vmul.f32 %v1908_v27, %v1649_v43 }
0x1596   :  { %v1691_v46 = vpop.f32.mrf.mxu3  ;;  %v1659_v47 = vadd.f32 %v1909_v29, %v1654_v45 }
0x1597   :  { %v1692_v49 = vadd.f32 %v1910_v44, %v1691_v46 }
0x1598   :  { %1845 = vmatmul.msk.f32.gmra.mxu3 %vm138_vm0, %v1659_v47  ;;  %vm1729_vm0 = vcmp.eq.s32.totalorder %v2224_v13, %v1725_v61 }
0x1599   :  { %v1697_v7 = vsel %vm651_vm12, %v1692_v49, -inf  ;;  %v1731_v63 = vsel %vm1729_vm0, %v1692_v49, 0.0 }
0x159a   :  { %1698 = vmax.xlane.f32.xlu0 %v1697_v7  ;;  %v1733_v0 = vsel %vm651_vm12, %v1731_v63, 0.0 }
0x15ae   :  { %1727 = vperm.xlu0 %1890, %v1722_v25  }
0x160d   :  { %v1699_v50 = vpop.xlane.xlu0 %1698 }
0x160e   :  { %v1703_v52 = vsub.f32 %v1692_v49, %v1699_v50 }
0x1610   :  { %v1705_v40 = vmul.f32 1.442695, %v1703_v52 }
0x1612   :  { %1973 = vpow2.f32 %v1705_v40 }
0x1618   :  { %v1974_v57 = vpop.eup %1973 }
0x1619   :  { %v1709_v51 = vsel %vm651_vm12, %v1974_v57, 0.0 }
0x161b   :  { %v1694_v53 = vpop.f32.mrf.mxu3 }
0x161c   :  { %v1695_v8 = vadd.f32 %v1910_v44, %v1694_v53 }
0x161e   :  { %v1700_v55 = vsel %vm651_vm12, %v1695_v8, -inf }
0x161f   :  { %1701 = vmax.xlane.f32.xlu2 %v1700_v55 }
0x1620   :  { %v1728_v56 = vpop.permute.xlu0 %1727 }
0x1621   :  { %vm1730_vm14 = vcmp.eq.s32.totalorder %v2224_v13, %v1728_v56 }
0x1622   :  { %v1732_v42 = vsel %vm1730_vm14, %v1695_v8, 0.0 }
0x1623   :  { %v1736_v48 = vsel %vm651_vm12, %v1732_v42, 0.0 }
0x1624   :  { %1737 = vadd.xlane.f32.xlu0 %v1736_v48 }
0x1627   :  { %1710 = vadd.xlane.f32.xlu2 %v1709_v51 }
0x1692   :  { %v1702_v59 = vpop.xlane.xlu2 %1701 }
0x1693   :  { %v1704_v36 = vsub.f32 %v1695_v8, %v1702_v59 }
0x1695   :  { %v1707_v15 = vmul.f32 1.442695, %v1704_v36 }
0x1697   :  { %1975 = vpow2.f32 %v1707_v15  ;;  %v1738_v54 = vpop.xlane.xlu0 %1737 }
0x169a   :  { %v1711_v1 = vpop.xlane.xlu2 %1710 }
0x169b   :  { %1977 = vlog2.f32 %v1711_v1 }
0x169d   :  { %v1976_v60 = vpop.eup %1975 }
0x169e   :  { %v1712_v62 = vsel %vm651_vm12, %v1976_v60, 0.0  ;;  %vm1748_vm12 = vcmask 0  }
0x169f   :  { %1713 = vadd.xlane.f32.xlu2 %v1712_v62 }
0x16a1   :  { %v1978_v5 = vpop.eup %1977 }
0x16a2   :  { %v1716_v6 = vmul.f32 0.6931472, %v1978_v5 }
0x16a4   :  { %v1719_v14 = vadd.f32 %v1716_v6, %v1699_v50 }
0x16a7   :  { %1734 = vadd.xlane.f32.xlu2 %v1733_v0 }
0x1712   :  { %v1714_v3 = vpop.xlane.xlu2 %1713 }
0x1713   :  { %1979 = vlog2.f32 %v1714_v3 }
0x1719   :  { %v1980_v4 = vpop.eup %1979 }
0x171a   :  { %v1718_v9 = vmul.f32 0.6931472, %v1980_v4  ;;  %v1735_v11 = vpop.xlane.xlu2 %1734 }
0x171b   :  { %v1739_v16 = vsub.f32 %v1719_v14, %v1735_v11 }
0x171c   :  { %v1720_v12 = vadd.f32 %v1718_v9, %v1702_v59 }
0x171e   :  { %v1740_v18 = vsub.f32 %v1720_v12, %v1738_v54 }
0x1720   :  { %v1741_v13 = vadd.f32 %v1740_v18, %v1739_v16 }
0x1722   :  { %v1742_v19 = vrot.slane %v1741_v13, 4 }
0x1724   :  { %v1743_v20 = vadd.f32 %v1742_v19, %v1741_v13 }
0x1726   :  { %v1744_v21 = vrot.slane %v1743_v20, 2 }
0x1728   :  { %v1745_v17 = vadd.f32 %v1744_v21, %v1743_v20 }
0x172a   :  { %v1746_v22 = vrot.slane %v1745_v17, 1 }
0x172c   :  { %v1747_v23 = vadd.f32 %v1746_v22, %v1745_v17 }
0x172e   :  { %1749 = vst.msk [vmem:[#allocation2] sm:$0x1] %vm1748_vm12, %v1747_v23 }
0x172f   :  { %2004 = shalt.err (!%p2001_p4)
}
0x1730   :  { %1760 = dma.vmem_to_hbm [thread:$0]  %s1756_s27, 16, %s1758_s11, [#allocation3]  }
0x1731   :  { %2005 = dma.done.wait [#allocation3], 16  }
0x1732   :  { %2006 = vsyncadd [#allocation3], 4294967280 }
0x1733   :  { %1765 = vsyncpa [#allocation3], 1 }

</bundles_post_ra>
